<compile_context>
chip_gen: v5e
topology: v5e:2x2
jax: 0.10.0
libtpu: 0.0.40
codegen_flags: <defaults>
</compile_context>

<pallas_src>
import math

import jax
import jax.numpy as jnp
from jax import lax
from jax.experimental import pallas as pl
from jax.experimental.pallas import tpu as pltpu

# Layer widths of the PyTorch module (fc1..fc23).
DIMS = [30, 40, 50, 60, 70, 80, 90, 100, 110, 120, 130,
        120, 110, 100, 90, 80, 70, 60, 50, 40, 30, 20, 10, 1]
NUM_LAYERS = len(DIMS) - 1  # 23

# Layers followed by GELU (0-indexed: fc1 -> 0, ...).  fc3/fc21/fc22 have no
# activation; fc23 is followed by sigmoid.
GELU_AFTER = {0, 1, 3, 4, 6, 7, 9, 10, 12, 13, 15, 16, 18, 19}
# TODO(synk): nn.Dropout(0.05) after fc6/fc9/fc12/fc15/fc18 is identity in eval
# mode; training-mode dropout is not implemented.

P = 128                      # padded lane width (all dims <= 128; 130 handled by split)
BATCH = 8                    # sublane-aligned batch
D_IN = DIMS[0]               # 30

# --- weight-tile packing -----------------------------------------------------
# tiles 0..8   : layers 0..8  (fc1..fc9)
# tile  9      : layer 9  (fc10) weight cols   0..127, bias[0:128]
# tile 10      : layer 9  (fc10) weight cols 128..129 (stored in cols 0..1), bias[128:130]
# tile 11      : layer 10 (fc11) weight rows   0..127, full bias
# tile 12      : layer 10 (fc11) weight rows 128..129 (stored in rows 0..1), zero bias row
# tiles 13..24 : layers 11..22 (fc12..fc23)
NUM_TILES = NUM_LAYERS + 2   # 25

# Manual weight-DMA chunks: (tile_start, n_tiles).  Boundaries are chosen so
# that no layer's tiles straddle a chunk boundary.
CHUNKS = [(0, 5), (5, 6), (11, 6), (17, 5), (22, 3)]
CHUNK_LAYERS = [range(0, 5), range(5, 10), range(10, 15), range(15, 20), range(20, 23)]
NUM_CHUNKS = len(CHUNKS)
MAX_CHUNK = max(n for _, n in CHUNKS)           # 6

TILE_LOC = {}                                   # tile index -> (buffer slot, local index)
for _c, (_s, _n) in enumerate(CHUNKS):
    for _t in range(_s, _s + _n):
        TILE_LOC[_t] = (_c & 1, _t - _s)

_INV_SQRT2 = 1.0 / math.sqrt(2.0)


def _gelu_exact(x):
    # PyTorch nn.GELU() default = exact erf-based GELU (computed in f32).
    return 0.5 * x * (1.0 + lax.erf(x * _INV_SQRT2))


def mlp_kernel(x_ref, b_ref, w_hbm, o_ref, wbuf, sems):
    """Whole 23-layer MLP in one grid step; weights streamed HBM->VMEM in chunks.

    x_ref: (BATCH, P)          f32   -- input, zero-padded to 128 lanes
    b_ref: (NUM_TILES, P)      f32   -- packed, zero-padded bias rows (VMEM)
    w_hbm: (NUM_TILES, P, P)   bf16  -- packed weight tiles, left in HBM (pl.ANY)
    o_ref: (BATCH, 1)          f32   -- model output (sigmoid)
    wbuf : (2, MAX_CHUNK, P,P) bf16  -- VMEM double buffer for weight chunks
    sems : DMA semaphores (2,)
    """
    copies = [None] * NUM_CHUNKS

    def start_chunk(c):
        start, size = CHUNKS[c]
        slot = c & 1
        cp = pltpu.make_async_copy(
            w_hbm.at[pl.ds(start, size)],
            wbuf.at[slot, pl.ds(0, size)],
            sems.at[slot])
        cp.start()
        copies[c] = cp

    # Prefetch the first chunk immediately: layer-0 compute only waits for
    # ~5 tiles (~160 KiB) instead of the full ~800 KiB weight block.
    start_chunk(0)

    def wtile(tile):
        slot, local = TILE_LOC[tile]
        return wbuf[slot, local]                          # (P, P) bf16

    def linear(h, tile, bias_row=None):
        if bias_row is None:
            bias_row = tile
        # bf16 x bf16 -> f32 accumulate: MXU-native; no per-layer weight up-cast.
        return (jnp.dot(h.astype(jnp.bfloat16), wtile(tile),
                        preferred_element_type=jnp.float32)
                + b_ref[pl.ds(bias_row, 1), :])

    h = x_ref[...]                                        # (B, P) f32
    h_main = h_extra = None

    for c in range(NUM_CHUNKS):
        copies[c].wait()
        if c + 1 < NUM_CHUNKS:
            start_chunk(c + 1)       # overlap next weight DMA with this chunk's matmuls
        for layer in CHUNK_LAYERS[c]:
            if layer == 9:
                # fc10 (120 -> 130), GELU after: output split cols 0..127 / 128..129.
                h_main = _gelu_exact(linear(h, 9))                    # cols 0..127
                h_extra = _gelu_exact(linear(h, 10, bias_row=10))     # cols 0..1 valid
            elif layer == 10:
                # fc11 (130 -> 120), GELU after: contract both halves; bias added once.
                h = (jnp.dot(h_main.astype(jnp.bfloat16), wtile(11),
                             preferred_element_type=jnp.float32)
                     + jnp.dot(h_extra.astype(jnp.bfloat16), wtile(12),
                               preferred_element_type=jnp.float32)
                     + b_ref[pl.ds(11, 1), :])
                h = _gelu_exact(h)
            else:
                tile = layer if layer < 9 else layer + 2
                h = linear(h, tile)
                if layer in GELU_AFTER:
                    h = _gelu_exact(h)

    # Sigmoid on the single valid output column (EUP exp + approx reciprocal).
    z = h[:, :1]
    o_ref[...] = pl.reciprocal(1.0 + jnp.exp(-z), approx=True).astype(o_ref.dtype)


@jax.jit
def neuralnet_forward(x, w_stack, b_stack):
    """x: (B, 30) f32 -> (B, 1) f32 (eval-mode forward of `neuralnet`)."""
    b = x.shape[0]
    # Zero-pad the 30-wide input to the 128-lane tile once outside the kernel
    # (removes the in-kernel scratch store/load round trip; ~4 KiB, negligible).
    x_p = jnp.pad(x, ((0, 0), (0, P - D_IN)))
    # TODO(synk): for large-batch inference add a 'parallel' batch-tile grid
    # axis (weights index_map constant) to use both v7x TensorCores.
    return pl.pallas_call(
        mlp_kernel,
        out_shape=jax.ShapeDtypeStruct((b, 1), jnp.float32),
        grid_spec=pltpu.PrefetchScalarGridSpec(
            num_scalar_prefetch=0,
            grid=(1,),   # fully serial 23-layer chain; weight DMA is hand-pipelined
            in_specs=[
                pl.BlockSpec((b, P), lambda i: (0, 0)),
                pl.BlockSpec((NUM_TILES, P), lambda i: (0, 0)),
                pl.BlockSpec(memory_space=pl.ANY),   # weights stay in HBM; manual DMA
            ],
            out_specs=pl.BlockSpec((b, 1), lambda i: (0, 0)),
            scratch_shapes=[
                pltpu.VMEM((2, MAX_CHUNK, P, P), jnp.bfloat16),  # weight double buffer (~384 KiB)
                pltpu.SemaphoreType.DMA((2,)),
            ],
        ),
        compiler_params=pltpu.CompilerParams(
            dimension_semantics=("arbitrary",),
            # Total footprint ~0.5 MiB; limit kept well under v7x's 64 MiB VMEM.
            vmem_limit_bytes=16 << 20,
        ),
    )(x_p, b_stack, w_stack)


def init_params(key):
    """PyTorch nn.Linear-style init (U[-1/sqrt(fan_in), +]); packs bf16 weight tiles."""
    ws, bs = [], []
    for layer in range(NUM_LAYERS):
        fan_in, fan_out = DIMS[layer], DIMS[layer + 1]
        key, kw, kb = jax.random.split(key, 3)
        bound = 1.0 / math.sqrt(fan_in)
        ws.append(jax.random.uniform(kw, (fan_in, fan_out), jnp.float32, -bound, bound))
        bs.append(jax.random.uniform(kb, (fan_out,), jnp.float32, -bound, bound))

    ws_q = [w.astype(jnp.bfloat16) for w in ws]   # MXU / storage dtype
    # Biases stay f32 (12.5 KiB total): removes 25 per-layer bf16->f32 casts
    # from the serial chain for negligible extra DMA.

    w_stack = jnp.zeros((NUM_TILES, P, P), jnp.bfloat16)
    b_stack = jnp.zeros((NUM_TILES, P), jnp.float32)

    def put_w(stack, tile, w):
        r, c = w.shape
        return stack.at[tile, :r, :c].set(w)

    def put_b(stack, tile, v):
        return stack.at[tile, :v.shape[0]].set(v)

    # Tiles 0..8: layers 0..8 (all dims <= 128).
    for layer in range(9):
        w_stack = put_w(w_stack, layer, ws_q[layer])
        b_stack = put_b(b_stack, layer, bs[layer])
    # Layer 9 (120 -> 130): output cols 0..127 -> tile 9, cols 128..129 -> tile 10.
    w_stack = put_w(w_stack, 9, ws_q[9][:, :P])
    b_stack = put_b(b_stack, 9, bs[9][:P])
    w_stack = put_w(w_stack, 10, ws_q[9][:, P:])
    b_stack = put_b(b_stack, 10, bs[9][P:])
    # Layer 10 (130 -> 120): input rows 0..127 -> tile 11, rows 128..129 -> tile 12.
    w_stack = put_w(w_stack, 11, ws_q[10][:P, :])
    b_stack = put_b(b_stack, 11, bs[10])
    w_stack = put_w(w_stack, 12, ws_q[10][P:, :])   # tile-12 bias row stays zero
    # Tiles 13..24: layers 11..22.
    for layer in range(11, NUM_LAYERS):
        w_stack = put_w(w_stack, layer + 2, ws_q[layer])
        b_stack = put_b(b_stack, layer + 2, bs[layer])

    return w_stack, b_stack, ws_q, bs


def reference_forward(x, ws_bf16, bs_f32):
    """Pure-JAX reference of the PyTorch forward (eval mode), mirroring the
    kernel's numerics: bf16 matmul operands, f32 accumulation, f32 bias/GELU."""
    h = x
    for layer in range(NUM_LAYERS):
        h = jnp.dot(h.astype(jnp.bfloat16), ws_bf16[layer],
                    preferred_element_type=jnp.float32) + bs_f32[layer]
        if layer in GELU_AFTER:
            h = _gelu_exact(h)
    return jax.nn.sigmoid(h)


if __name__ == "__main__":
    key = jax.random.PRNGKey(0)
    key, kx = jax.random.split(key)
    x = jax.random.normal(kx, (BATCH, D_IN), jnp.float32)

    w_stack, b_stack, ws_ref, bs_ref = init_params(key)

    out = jax.block_until_ready(neuralnet_forward(x, w_stack, b_stack))

    ref = reference_forward(x, ws_ref, bs_ref)
    assert out.shape == (BATCH, 1)
    # Tolerance covers the approximate EUP reciprocal in the final sigmoid;
    # the matmul path matches the reference's bf16/f32 numerics exactly.
    assert jnp.allclose(out, ref, atol=5e-3, rtol=5e-3), (out, ref)

    print("KERNEL_OK")
</pallas_src>

<mosaic_0001>
module attributes {stable_mosaic.version = 11 : i64} {
  func.func @mlp_kernel(%arg0: i32, %arg1: memref<8x128xf32, #tpu.memory_space<vmem>>, %arg2: memref<25x128xf32, #tpu.memory_space<vmem>>, %arg3: memref<25x128x128xbf16, #tpu.memory_space<any>>, %arg4: memref<8x1xf32, #tpu.memory_space<vmem>>, %arg5: memref<2x6x128x128xbf16, #tpu.memory_space<vmem>>, %arg6: memref<2x!tpu.dma_semaphore, #tpu.memory_space<semaphore_mem>>) attributes {dimension_semantics = [#tpu.dimension_semantics<arbitrary>], iteration_bounds = array<i64: 1>, scalar_prefetch = 0 : i64, scratch_operands = 2 : i64, tpu.core_type = #tpu.core_type<tc>, window_params = [{pipeline_mode = #tpu.pipeline_mode<synchronous>, transform_indices = @transform_0, window_bounds = array<i64: 8, 128>}, {pipeline_mode = #tpu.pipeline_mode<synchronous>, transform_indices = @transform_1, window_bounds = array<i64: 25, 128>}, {}, {pipeline_mode = #tpu.pipeline_mode<synchronous>, transform_indices = @transform_3, window_bounds = array<i64: 8, 1>}]} {
    %c0_i32 = arith.constant 0 : i32
    %c0_i32_0 = arith.constant 0 : i32
    %c0_i32_1 = arith.constant 0 : i32
    %c0_i32_2 = arith.constant 0 : i32
    %c0_i32_3 = arith.constant 0 : i32
    %0 = tpu.memref_slice %arg3[%c0_i32_1, %c0_i32_2, %c0_i32_3] : memref<25x128x128xbf16, #tpu.memory_space<any>> -> memref<5x128x128xbf16, #tpu.memory_space<any>>
    %c0_i32_4 = arith.constant 0 : i32
    %c0_i32_5 = arith.constant 0 : i32
    %c0_i32_6 = arith.constant 0 : i32
    %1 = tpu.memref_slice %arg5[%c0_i32, %c0_i32_4, %c0_i32_5, %c0_i32_6] : memref<2x6x128x128xbf16, #tpu.memory_space<vmem>> -> memref<1x5x128x128xbf16, #tpu.memory_space<vmem>>
    %2 = tpu.memref_squeeze %1 : memref<1x5x128x128xbf16, #tpu.memory_space<vmem>> -> memref<5x128x128xbf16, #tpu.memory_space<vmem>>
    %3 = tpu.memref_slice %arg6[%c0_i32_0] : memref<2x!tpu.dma_semaphore, #tpu.memory_space<semaphore_mem>> -> memref<1x!tpu.dma_semaphore, #tpu.memory_space<semaphore_mem>>
    %4 = tpu.memref_squeeze %3 : memref<1x!tpu.dma_semaphore, #tpu.memory_space<semaphore_mem>> -> memref<!tpu.dma_semaphore, #tpu.memory_space<semaphore_mem>>
    tpu.enqueue_dma source(%0 : memref<5x128x128xbf16, #tpu.memory_space<any>>) target(%2 : memref<5x128x128xbf16, #tpu.memory_space<vmem>>) target_semaphore(%4 : memref<!tpu.dma_semaphore, #tpu.memory_space<semaphore_mem>>)
    %c0 = arith.constant 0 : index
    %c0_7 = arith.constant 0 : index
    %5 = vector.load %arg1[%c0, %c0_7] : memref<8x128xf32, #tpu.memory_space<vmem>>, vector<8x128xf32>
    %c0_i32_8 = arith.constant 0 : i32
    %c0_i32_9 = arith.constant 0 : i32
    %c0_i32_10 = arith.constant 0 : i32
    %c0_i32_11 = arith.constant 0 : i32
    %c0_i32_12 = arith.constant 0 : i32
    %6 = tpu.memref_slice %arg3[%c0_i32_10, %c0_i32_11, %c0_i32_12] : memref<25x128x128xbf16, #tpu.memory_space<any>> -> memref<5x128x128xbf16, #tpu.memory_space<any>>
    %c0_i32_13 = arith.constant 0 : i32
    %c0_i32_14 = arith.constant 0 : i32
    %c0_i32_15 = arith.constant 0 : i32
    %7 = tpu.memref_slice %arg5[%c0_i32_8, %c0_i32_13, %c0_i32_14, %c0_i32_15] : memref<2x6x128x128xbf16, #tpu.memory_space<vmem>> -> memref<1x5x128x128xbf16, #tpu.memory_space<vmem>>
    %8 = tpu.memref_squeeze %7 : memref<1x5x128x128xbf16, #tpu.memory_space<vmem>> -> memref<5x128x128xbf16, #tpu.memory_space<vmem>>
    %9 = tpu.memref_slice %arg6[%c0_i32_9] : memref<2x!tpu.dma_semaphore, #tpu.memory_space<semaphore_mem>> -> memref<1x!tpu.dma_semaphore, #tpu.memory_space<semaphore_mem>>
    %10 = tpu.memref_squeeze %9 : memref<1x!tpu.dma_semaphore, #tpu.memory_space<semaphore_mem>> -> memref<!tpu.dma_semaphore, #tpu.memory_space<semaphore_mem>>
    tpu.wait_dma2 semaphore(%10 : memref<!tpu.dma_semaphore, #tpu.memory_space<semaphore_mem>>) src(%6 : memref<5x128x128xbf16, #tpu.memory_space<any>>) dst(%8 : memref<5x128x128xbf16, #tpu.memory_space<vmem>>)
    %c1_i32 = arith.constant 1 : i32
    %c1_i32_16 = arith.constant 1 : i32
    %c5_i32 = arith.constant 5 : i32
    %c0_i32_17 = arith.constant 0 : i32
    %c0_i32_18 = arith.constant 0 : i32
    %11 = tpu.memref_slice %arg3[%c5_i32, %c0_i32_17, %c0_i32_18] : memref<25x128x128xbf16, #tpu.memory_space<any>> -> memref<6x128x128xbf16, #tpu.memory_space<any>>
    %c0_i32_19 = arith.constant 0 : i32
    %c0_i32_20 = arith.constant 0 : i32
    %c0_i32_21 = arith.constant 0 : i32
    %12 = tpu.memref_slice %arg5[%c1_i32, %c0_i32_19, %c0_i32_20, %c0_i32_21] : memref<2x6x128x128xbf16, #tpu.memory_space<vmem>> -> memref<1x6x128x128xbf16, #tpu.memory_space<vmem>>
    %13 = tpu.memref_squeeze %12 : memref<1x6x128x128xbf16, #tpu.memory_space<vmem>> -> memref<6x128x128xbf16, #tpu.memory_space<vmem>>
    %14 = tpu.memref_slice %arg6[%c1_i32_16] : memref<2x!tpu.dma_semaphore, #tpu.memory_space<semaphore_mem>> -> memref<1x!tpu.dma_semaphore, #tpu.memory_space<semaphore_mem>>
    %15 = tpu.memref_squeeze %14 : memref<1x!tpu.dma_semaphore, #tpu.memory_space<semaphore_mem>> -> memref<!tpu.dma_semaphore, #tpu.memory_space<semaphore_mem>>
    tpu.enqueue_dma source(%11 : memref<6x128x128xbf16, #tpu.memory_space<any>>) target(%13 : memref<6x128x128xbf16, #tpu.memory_space<vmem>>) target_semaphore(%15 : memref<!tpu.dma_semaphore, #tpu.memory_space<semaphore_mem>>)
    %16 = arith.truncf %5 : vector<8x128xf32> to vector<8x128xbf16>
    %c0_22 = arith.constant 0 : index
    %c0_23 = arith.constant 0 : index
    %c0_24 = arith.constant 0 : index
    %c0_25 = arith.constant 0 : index
    %17 = vector.load %arg5[%c0_22, %c0_23, %c0_24, %c0_25] : memref<2x6x128x128xbf16, #tpu.memory_space<vmem>>, vector<1x1x128x128xbf16>
    %18 = vector.shape_cast %17 : vector<1x1x128x128xbf16> to vector<128x128xbf16>
    %cst = arith.constant dense<0.000000e+00> : vector<8x128xf32>
    %19 = tpu.matmul %16, %18, %cst {dimension_numbers = #tpu.dot_dimension_numbers<[1], [0], [0], [1], [0, 0, 1, 1], [], []>} : vector<8x128xbf16>, vector<128x128xbf16>, vector<8x128xf32> -> vector<8x128xf32>
    %c0_26 = arith.constant 0 : index
    %c0_27 = arith.constant 0 : index
    %20 = vector.load %arg2[%c0_26, %c0_27] : memref<25x128xf32, #tpu.memory_space<vmem>>, vector<1x128xf32>
    %21 = vector.broadcast %20 : vector<1x128xf32> to vector<8x128xf32>
    %22 = arith.addf %19, %21 : vector<8x128xf32>
    %cst_28 = arith.constant 5.000000e-01 : f32
    %23 = vector.broadcast %cst_28 : f32 to vector<8x128xf32>
    %24 = arith.mulf %23, %22 : vector<8x128xf32>
    %cst_29 = arith.constant 0.707106769 : f32
    %25 = vector.broadcast %cst_29 : f32 to vector<8x128xf32>
    %26 = arith.mulf %22, %25 : vector<8x128xf32>
    %27 = math.erf %26 : vector<8x128xf32>
    %cst_30 = arith.constant 1.000000e+00 : f32
    %28 = vector.broadcast %cst_30 : f32 to vector<8x128xf32>
    %29 = arith.addf %28, %27 : vector<8x128xf32>
    %30 = arith.mulf %24, %29 : vector<8x128xf32>
    %31 = arith.truncf %30 : vector<8x128xf32> to vector<8x128xbf16>
    %c0_31 = arith.constant 0 : index
    %c1 = arith.constant 1 : index
    %c0_32 = arith.constant 0 : index
    %c0_33 = arith.constant 0 : index
    %32 = vector.load %arg5[%c0_31, %c1, %c0_32, %c0_33] : memref<2x6x128x128xbf16, #tpu.memory_space<vmem>>, vector<1x1x128x128xbf16>
    %33 = vector.shape_cast %32 : vector<1x1x128x128xbf16> to vector<128x128xbf16>
    %cst_34 = arith.constant dense<0.000000e+00> : vector<8x128xf32>
    %34 = tpu.matmul %31, %33, %cst_34 {dimension_numbers = #tpu.dot_dimension_numbers<[1], [0], [0], [1], [0, 0, 1, 1], [], []>} : vector<8x128xbf16>, vector<128x128xbf16>, vector<8x128xf32> -> vector<8x128xf32>
    %c1_35 = arith.constant 1 : index
    %c0_36 = arith.constant 0 : index
    %35 = vector.load %arg2[%c1_35, %c0_36] : memref<25x128xf32, #tpu.memory_space<vmem>>, vector<1x128xf32>
    %36 = vector.broadcast %35 : vector<1x128xf32> to vector<8x128xf32>
    %37 = arith.addf %34, %36 : vector<8x128xf32>
    %cst_37 = arith.constant 5.000000e-01 : f32
    %38 = vector.broadcast %cst_37 : f32 to vector<8x128xf32>
    %39 = arith.mulf %38, %37 : vector<8x128xf32>
    %cst_38 = arith.constant 0.707106769 : f32
    %40 = vector.broadcast %cst_38 : f32 to vector<8x128xf32>
    %41 = arith.mulf %37, %40 : vector<8x128xf32>
    %42 = math.erf %41 : vector<8x128xf32>
    %cst_39 = arith.constant 1.000000e+00 : f32
    %43 = vector.broadcast %cst_39 : f32 to vector<8x128xf32>
    %44 = arith.addf %43, %42 : vector<8x128xf32>
    %45 = arith.mulf %39, %44 : vector<8x128xf32>
    %46 = arith.truncf %45 : vector<8x128xf32> to vector<8x128xbf16>
    %c0_40 = arith.constant 0 : index
    %c2 = arith.constant 2 : index
    %c0_41 = arith.constant 0 : index
    %c0_42 = arith.constant 0 : index
    %47 = vector.load %arg5[%c0_40, %c2, %c0_41, %c0_42] : memref<2x6x128x128xbf16, #tpu.memory_space<vmem>>, vector<1x1x128x128xbf16>
    %48 = vector.shape_cast %47 : vector<1x1x128x128xbf16> to vector<128x128xbf16>
    %cst_43 = arith.constant dense<0.000000e+00> : vector<8x128xf32>
    %49 = tpu.matmul %46, %48, %cst_43 {dimension_numbers = #tpu.dot_dimension_numbers<[1], [0], [0], [1], [0, 0, 1, 1], [], []>} : vector<8x128xbf16>, vector<128x128xbf16>, vector<8x128xf32> -> vector<8x128xf32>
    %c2_44 = arith.constant 2 : index
    %c0_45 = arith.constant 0 : index
    %50 = vector.load %arg2[%c2_44, %c0_45] : memref<25x128xf32, #tpu.memory_space<vmem>>, vector<1x128xf32>
    %51 = vector.broadcast %50 : vector<1x128xf32> to vector<8x128xf32>
    %52 = arith.addf %49, %51 : vector<8x128xf32>
    %53 = arith.truncf %52 : vector<8x128xf32> to vector<8x128xbf16>
    %c0_46 = arith.constant 0 : index
    %c3 = arith.constant 3 : index
    %c0_47 = arith.constant 0 : index
    %c0_48 = arith.constant 0 : index
    %54 = vector.load %arg5[%c0_46, %c3, %c0_47, %c0_48] : memref<2x6x128x128xbf16, #tpu.memory_space<vmem>>, vector<1x1x128x128xbf16>
    %55 = vector.shape_cast %54 : vector<1x1x128x128xbf16> to vector<128x128xbf16>
    %cst_49 = arith.constant dense<0.000000e+00> : vector<8x128xf32>
    %56 = tpu.matmul %53, %55, %cst_49 {dimension_numbers = #tpu.dot_dimension_numbers<[1], [0], [0], [1], [0, 0, 1, 1], [], []>} : vector<8x128xbf16>, vector<128x128xbf16>, vector<8x128xf32> -> vector<8x128xf32>
    %c3_50 = arith.constant 3 : index
    %c0_51 = arith.constant 0 : index
    %57 = vector.load %arg2[%c3_50, %c0_51] : memref<25x128xf32, #tpu.memory_space<vmem>>, vector<1x128xf32>
    %58 = vector.broadcast %57 : vector<1x128xf32> to vector<8x128xf32>
    %59 = arith.addf %56, %58 : vector<8x128xf32>
    %cst_52 = arith.constant 5.000000e-01 : f32
    %60 = vector.broadcast %cst_52 : f32 to vector<8x128xf32>
    %61 = arith.mulf %60, %59 : vector<8x128xf32>
    %cst_53 = arith.constant 0.707106769 : f32
    %62 = vector.broadcast %cst_53 : f32 to vector<8x128xf32>
    %63 = arith.mulf %59, %62 : vector<8x128xf32>
    %64 = math.erf %63 : vector<8x128xf32>
    %cst_54 = arith.constant 1.000000e+00 : f32
    %65 = vector.broadcast %cst_54 : f32 to vector<8x128xf32>
    %66 = arith.addf %65, %64 : vector<8x128xf32>
    %67 = arith.mulf %61, %66 : vector<8x128xf32>
    %68 = arith.truncf %67 : vector<8x128xf32> to vector<8x128xbf16>
    %c0_55 = arith.constant 0 : index
    %c4 = arith.constant 4 : index
    %c0_56 = arith.constant 0 : index
    %c0_57 = arith.constant 0 : index
    %69 = vector.load %arg5[%c0_55, %c4, %c0_56, %c0_57] : memref<2x6x128x128xbf16, #tpu.memory_space<vmem>>, vector<1x1x128x128xbf16>
    %70 = vector.shape_cast %69 : vector<1x1x128x128xbf16> to vector<128x128xbf16>
    %cst_58 = arith.constant dense<0.000000e+00> : vector<8x128xf32>
    %71 = tpu.matmul %68, %70, %cst_58 {dimension_numbers = #tpu.dot_dimension_numbers<[1], [0], [0], [1], [0, 0, 1, 1], [], []>} : vector<8x128xbf16>, vector<128x128xbf16>, vector<8x128xf32> -> vector<8x128xf32>
    %c4_59 = arith.constant 4 : index
    %c0_60 = arith.constant 0 : index
    %72 = vector.load %arg2[%c4_59, %c0_60] : memref<25x128xf32, #tpu.memory_space<vmem>>, vector<1x128xf32>
    %73 = vector.broadcast %72 : vector<1x128xf32> to vector<8x128xf32>
    %74 = arith.addf %71, %73 : vector<8x128xf32>
    %cst_61 = arith.constant 5.000000e-01 : f32
    %75 = vector.broadcast %cst_61 : f32 to vector<8x128xf32>
    %76 = arith.mulf %75, %74 : vector<8x128xf32>
    %cst_62 = arith.constant 0.707106769 : f32
    %77 = vector.broadcast %cst_62 : f32 to vector<8x128xf32>
    %78 = arith.mulf %74, %77 : vector<8x128xf32>
    %79 = math.erf %78 : vector<8x128xf32>
    %cst_63 = arith.constant 1.000000e+00 : f32
    %80 = vector.broadcast %cst_63 : f32 to vector<8x128xf32>
    %81 = arith.addf %80, %79 : vector<8x128xf32>
    %82 = arith.mulf %76, %81 : vector<8x128xf32>
    %c1_i32_64 = arith.constant 1 : i32
    %c1_i32_65 = arith.constant 1 : i32
    %c5_i32_66 = arith.constant 5 : i32
    %c0_i32_67 = arith.constant 0 : i32
    %c0_i32_68 = arith.constant 0 : i32
    %83 = tpu.memref_slice %arg3[%c5_i32_66, %c0_i32_67, %c0_i32_68] : memref<25x128x128xbf16, #tpu.memory_space<any>> -> memref<6x128x128xbf16, #tpu.memory_space<any>>
    %c0_i32_69 = arith.constant 0 : i32
    %c0_i32_70 = arith.constant 0 : i32
    %c0_i32_71 = arith.constant 0 : i32
    %84 = tpu.memref_slice %arg5[%c1_i32_64, %c0_i32_69, %c0_i32_70, %c0_i32_71] : memref<2x6x128x128xbf16, #tpu.memory_space<vmem>> -> memref<1x6x128x128xbf16, #tpu.memory_space<vmem>>
    %85 = tpu.memref_squeeze %84 : memref<1x6x128x128xbf16, #tpu.memory_space<vmem>> -> memref<6x128x128xbf16, #tpu.memory_space<vmem>>
    %86 = tpu.memref_slice %arg6[%c1_i32_65] : memref<2x!tpu.dma_semaphore, #tpu.memory_space<semaphore_mem>> -> memref<1x!tpu.dma_semaphore, #tpu.memory_space<semaphore_mem>>
    %87 = tpu.memref_squeeze %86 : memref<1x!tpu.dma_semaphore, #tpu.memory_space<semaphore_mem>> -> memref<!tpu.dma_semaphore, #tpu.memory_space<semaphore_mem>>
    tpu.wait_dma2 semaphore(%87 : memref<!tpu.dma_semaphore, #tpu.memory_space<semaphore_mem>>) src(%83 : memref<6x128x128xbf16, #tpu.memory_space<any>>) dst(%85 : memref<6x128x128xbf16, #tpu.memory_space<vmem>>)
    %c0_i32_72 = arith.constant 0 : i32
    %c0_i32_73 = arith.constant 0 : i32
    %c11_i32 = arith.constant 11 : i32
    %c0_i32_74 = arith.constant 0 : i32
    %c0_i32_75 = arith.constant 0 : i32
    %88 = tpu.memref_slice %arg3[%c11_i32, %c0_i32_74, %c0_i32_75] : memref<25x128x128xbf16, #tpu.memory_space<any>> -> memref<6x128x128xbf16, #tpu.memory_space<any>>
    %c0_i32_76 = arith.constant 0 : i32
    %c0_i32_77 = arith.constant 0 : i32
    %c0_i32_78 = arith.constant 0 : i32
    %89 = tpu.memref_slice %arg5[%c0_i32_72, %c0_i32_76, %c0_i32_77, %c0_i32_78] : memref<2x6x128x128xbf16, #tpu.memory_space<vmem>> -> memref<1x6x128x128xbf16, #tpu.memory_space<vmem>>
    %90 = tpu.memref_squeeze %89 : memref<1x6x128x128xbf16, #tpu.memory_space<vmem>> -> memref<6x128x128xbf16, #tpu.memory_space<vmem>>
    %91 = tpu.memref_slice %arg6[%c0_i32_73] : memref<2x!tpu.dma_semaphore, #tpu.memory_space<semaphore_mem>> -> memref<1x!tpu.dma_semaphore, #tpu.memory_space<semaphore_mem>>
    %92 = tpu.memref_squeeze %91 : memref<1x!tpu.dma_semaphore, #tpu.memory_space<semaphore_mem>> -> memref<!tpu.dma_semaphore, #tpu.memory_space<semaphore_mem>>
    tpu.enqueue_dma source(%88 : memref<6x128x128xbf16, #tpu.memory_space<any>>) target(%90 : memref<6x128x128xbf16, #tpu.memory_space<vmem>>) target_semaphore(%92 : memref<!tpu.dma_semaphore, #tpu.memory_space<semaphore_mem>>)
    %93 = arith.truncf %82 : vector<8x128xf32> to vector<8x128xbf16>
    %c1_79 = arith.constant 1 : index
    %c0_80 = arith.constant 0 : index
    %c0_81 = arith.constant 0 : index
    %c0_82 = arith.constant 0 : index
    %94 = vector.load %arg5[%c1_79, %c0_80, %c0_81, %c0_82] : memref<2x6x128x128xbf16, #tpu.memory_space<vmem>>, vector<1x1x128x128xbf16>
    %95 = vector.shape_cast %94 : vector<1x1x128x128xbf16> to vector<128x128xbf16>
    %cst_83 = arith.constant dense<0.000000e+00> : vector<8x128xf32>
    %96 = tpu.matmul %93, %95, %cst_83 {dimension_numbers = #tpu.dot_dimension_numbers<[1], [0], [0], [1], [0, 0, 1, 1], [], []>} : vector<8x128xbf16>, vector<128x128xbf16>, vector<8x128xf32> -> vector<8x128xf32>
    %c5 = arith.constant 5 : index
    %c0_84 = arith.constant 0 : index
    %97 = vector.load %arg2[%c5, %c0_84] : memref<25x128xf32, #tpu.memory_space<vmem>>, vector<1x128xf32>
    %98 = vector.broadcast %97 : vector<1x128xf32> to vector<8x128xf32>
    %99 = arith.addf %96, %98 : vector<8x128xf32>
    %100 = arith.truncf %99 : vector<8x128xf32> to vector<8x128xbf16>
    %c1_85 = arith.constant 1 : index
    %c1_86 = arith.constant 1 : index
    %c0_87 = arith.constant 0 : index
    %c0_88 = arith.constant 0 : index
    %101 = vector.load %arg5[%c1_85, %c1_86, %c0_87, %c0_88] : memref<2x6x128x128xbf16, #tpu.memory_space<vmem>>, vector<1x1x128x128xbf16>
    %102 = vector.shape_cast %101 : vector<1x1x128x128xbf16> to vector<128x128xbf16>
    %cst_89 = arith.constant dense<0.000000e+00> : vector<8x128xf32>
    %103 = tpu.matmul %100, %102, %cst_89 {dimension_numbers = #tpu.dot_dimension_numbers<[1], [0], [0], [1], [0, 0, 1, 1], [], []>} : vector<8x128xbf16>, vector<128x128xbf16>, vector<8x128xf32> -> vector<8x128xf32>
    %c6 = arith.constant 6 : index
    %c0_90 = arith.constant 0 : index
    %104 = vector.load %arg2[%c6, %c0_90] : memref<25x128xf32, #tpu.memory_space<vmem>>, vector<1x128xf32>
    %105 = vector.broadcast %104 : vector<1x128xf32> to vector<8x128xf32>
    %106 = arith.addf %103, %105 : vector<8x128xf32>
    %cst_91 = arith.constant 5.000000e-01 : f32
    %107 = vector.broadcast %cst_91 : f32 to vector<8x128xf32>
    %108 = arith.mulf %107, %106 : vector<8x128xf32>
    %cst_92 = arith.constant 0.707106769 : f32
    %109 = vector.broadcast %cst_92 : f32 to vector<8x128xf32>
    %110 = arith.mulf %106, %109 : vector<8x128xf32>
    %111 = math.erf %110 : vector<8x128xf32>
    %cst_93 = arith.constant 1.000000e+00 : f32
    %112 = vector.broadcast %cst_93 : f32 to vector<8x128xf32>
    %113 = arith.addf %112, %111 : vector<8x128xf32>
    %114 = arith.mulf %108, %113 : vector<8x128xf32>
    %115 = arith.truncf %114 : vector<8x128xf32> to vector<8x128xbf16>
    %c1_94 = arith.constant 1 : index
    %c2_95 = arith.constant 2 : index
    %c0_96 = arith.constant 0 : index
    %c0_97 = arith.constant 0 : index
    %116 = vector.load %arg5[%c1_94, %c2_95, %c0_96, %c0_97] : memref<2x6x128x128xbf16, #tpu.memory_space<vmem>>, vector<1x1x128x128xbf16>
    %117 = vector.shape_cast %116 : vector<1x1x128x128xbf16> to vector<128x128xbf16>
    %cst_98 = arith.constant dense<0.000000e+00> : vector<8x128xf32>
    %118 = tpu.matmul %115, %117, %cst_98 {dimension_numbers = #tpu.dot_dimension_numbers<[1], [0], [0], [1], [0, 0, 1, 1], [], []>} : vector<8x128xbf16>, vector<128x128xbf16>, vector<8x128xf32> -> vector<8x128xf32>
    %c7 = arith.constant 7 : index
    %c0_99 = arith.constant 0 : index
    %119 = vector.load %arg2[%c7, %c0_99] : memref<25x128xf32, #tpu.memory_space<vmem>>, vector<1x128xf32>
    %120 = vector.broadcast %119 : vector<1x128xf32> to vector<8x128xf32>
    %121 = arith.addf %118, %120 : vector<8x128xf32>
    %cst_100 = arith.constant 5.000000e-01 : f32
    %122 = vector.broadcast %cst_100 : f32 to vector<8x128xf32>
    %123 = arith.mulf %122, %121 : vector<8x128xf32>
    %cst_101 = arith.constant 0.707106769 : f32
    %124 = vector.broadcast %cst_101 : f32 to vector<8x128xf32>
    %125 = arith.mulf %121, %124 : vector<8x128xf32>
    %126 = math.erf %125 : vector<8x128xf32>
    %cst_102 = arith.constant 1.000000e+00 : f32
    %127 = vector.broadcast %cst_102 : f32 to vector<8x128xf32>
    %128 = arith.addf %127, %126 : vector<8x128xf32>
    %129 = arith.mulf %123, %128 : vector<8x128xf32>
    %130 = arith.truncf %129 : vector<8x128xf32> to vector<8x128xbf16>
    %c1_103 = arith.constant 1 : index
    %c3_104 = arith.constant 3 : index
    %c0_105 = arith.constant 0 : index
    %c0_106 = arith.constant 0 : index
    %131 = vector.load %arg5[%c1_103, %c3_104, %c0_105, %c0_106] : memref<2x6x128x128xbf16, #tpu.memory_space<vmem>>, vector<1x1x128x128xbf16>
    %132 = vector.shape_cast %131 : vector<1x1x128x128xbf16> to vector<128x128xbf16>
    %cst_107 = arith.constant dense<0.000000e+00> : vector<8x128xf32>
    %133 = tpu.matmul %130, %132, %cst_107 {dimension_numbers = #tpu.dot_dimension_numbers<[1], [0], [0], [1], [0, 0, 1, 1], [], []>} : vector<8x128xbf16>, vector<128x128xbf16>, vector<8x128xf32> -> vector<8x128xf32>
    %c8 = arith.constant 8 : index
    %c0_108 = arith.constant 0 : index
    %134 = vector.load %arg2[%c8, %c0_108] : memref<25x128xf32, #tpu.memory_space<vmem>>, vector<1x128xf32>
    %135 = vector.broadcast %134 : vector<1x128xf32> to vector<8x128xf32>
    %136 = arith.addf %133, %135 : vector<8x128xf32>
    %137 = arith.truncf %136 : vector<8x128xf32> to vector<8x128xbf16>
    %c1_109 = arith.constant 1 : index
    %c4_110 = arith.constant 4 : index
    %c0_111 = arith.constant 0 : index
    %c0_112 = arith.constant 0 : index
    %138 = vector.load %arg5[%c1_109, %c4_110, %c0_111, %c0_112] : memref<2x6x128x128xbf16, #tpu.memory_space<vmem>>, vector<1x1x128x128xbf16>
    %139 = vector.shape_cast %138 : vector<1x1x128x128xbf16> to vector<128x128xbf16>
    %cst_113 = arith.constant dense<0.000000e+00> : vector<8x128xf32>
    %140 = tpu.matmul %137, %139, %cst_113 {dimension_numbers = #tpu.dot_dimension_numbers<[1], [0], [0], [1], [0, 0, 1, 1], [], []>} : vector<8x128xbf16>, vector<128x128xbf16>, vector<8x128xf32> -> vector<8x128xf32>
    %c9 = arith.constant 9 : index
    %c0_114 = arith.constant 0 : index
    %141 = vector.load %arg2[%c9, %c0_114] : memref<25x128xf32, #tpu.memory_space<vmem>>, vector<1x128xf32>
    %142 = vector.broadcast %141 : vector<1x128xf32> to vector<8x128xf32>
    %143 = arith.addf %140, %142 : vector<8x128xf32>
    %cst_115 = arith.constant 5.000000e-01 : f32
    %144 = vector.broadcast %cst_115 : f32 to vector<8x128xf32>
    %145 = arith.mulf %144, %143 : vector<8x128xf32>
    %cst_116 = arith.constant 0.707106769 : f32
    %146 = vector.broadcast %cst_116 : f32 to vector<8x128xf32>
    %147 = arith.mulf %143, %146 : vector<8x128xf32>
    %148 = math.erf %147 : vector<8x128xf32>
    %cst_117 = arith.constant 1.000000e+00 : f32
    %149 = vector.broadcast %cst_117 : f32 to vector<8x128xf32>
    %150 = arith.addf %149, %148 : vector<8x128xf32>
    %151 = arith.mulf %145, %150 : vector<8x128xf32>
    %152 = arith.truncf %136 : vector<8x128xf32> to vector<8x128xbf16>
    %c1_118 = arith.constant 1 : index
    %c5_119 = arith.constant 5 : index
    %c0_120 = arith.constant 0 : index
    %c0_121 = arith.constant 0 : index
    %153 = vector.load %arg5[%c1_118, %c5_119, %c0_120, %c0_121] : memref<2x6x128x128xbf16, #tpu.memory_space<vmem>>, vector<1x1x128x128xbf16>
    %154 = vector.shape_cast %153 : vector<1x1x128x128xbf16> to vector<128x128xbf16>
    %cst_122 = arith.constant dense<0.000000e+00> : vector<8x128xf32>
    %155 = tpu.matmul %152, %154, %cst_122 {dimension_numbers = #tpu.dot_dimension_numbers<[1], [0], [0], [1], [0, 0, 1, 1], [], []>} : vector<8x128xbf16>, vector<128x128xbf16>, vector<8x128xf32> -> vector<8x128xf32>
    %c10 = arith.constant 10 : index
    %c0_123 = arith.constant 0 : index
    %156 = vector.load %arg2[%c10, %c0_123] : memref<25x128xf32, #tpu.memory_space<vmem>>, vector<1x128xf32>
    %157 = vector.broadcast %156 : vector<1x128xf32> to vector<8x128xf32>
    %158 = arith.addf %155, %157 : vector<8x128xf32>
    %cst_124 = arith.constant 5.000000e-01 : f32
    %159 = vector.broadcast %cst_124 : f32 to vector<8x128xf32>
    %160 = arith.mulf %159, %158 : vector<8x128xf32>
    %cst_125 = arith.constant 0.707106769 : f32
    %161 = vector.broadcast %cst_125 : f32 to vector<8x128xf32>
    %162 = arith.mulf %158, %161 : vector<8x128xf32>
    %163 = math.erf %162 : vector<8x128xf32>
    %cst_126 = arith.constant 1.000000e+00 : f32
    %164 = vector.broadcast %cst_126 : f32 to vector<8x128xf32>
    %165 = arith.addf %164, %163 : vector<8x128xf32>
    %166 = arith.mulf %160, %165 : vector<8x128xf32>
    %c0_i32_127 = arith.constant 0 : i32
    %c0_i32_128 = arith.constant 0 : i32
    %c11_i32_129 = arith.constant 11 : i32
    %c0_i32_130 = arith.constant 0 : i32
    %c0_i32_131 = arith.constant 0 : i32
    %167 = tpu.memref_slice %arg3[%c11_i32_129, %c0_i32_130, %c0_i32_131] : memref<25x128x128xbf16, #tpu.memory_space<any>> -> memref<6x128x128xbf16, #tpu.memory_space<any>>
    %c0_i32_132 = arith.constant 0 : i32
    %c0_i32_133 = arith.constant 0 : i32
    %c0_i32_134 = arith.constant 0 : i32
    %168 = tpu.memref_slice %arg5[%c0_i32_127, %c0_i32_132, %c0_i32_133, %c0_i32_134] : memref<2x6x128x128xbf16, #tpu.memory_space<vmem>> -> memref<1x6x128x128xbf16, #tpu.memory_space<vmem>>
    %169 = tpu.memref_squeeze %168 : memref<1x6x128x128xbf16, #tpu.memory_space<vmem>> -> memref<6x128x128xbf16, #tpu.memory_space<vmem>>
    %170 = tpu.memref_slice %arg6[%c0_i32_128] : memref<2x!tpu.dma_semaphore, #tpu.memory_space<semaphore_mem>> -> memref<1x!tpu.dma_semaphore, #tpu.memory_space<semaphore_mem>>
    %171 = tpu.memref_squeeze %170 : memref<1x!tpu.dma_semaphore, #tpu.memory_space<semaphore_mem>> -> memref<!tpu.dma_semaphore, #tpu.memory_space<semaphore_mem>>
    tpu.wait_dma2 semaphore(%171 : memref<!tpu.dma_semaphore, #tpu.memory_space<semaphore_mem>>) src(%167 : memref<6x128x128xbf16, #tpu.memory_space<any>>) dst(%169 : memref<6x128x128xbf16, #tpu.memory_space<vmem>>)
    %c1_i32_135 = arith.constant 1 : i32
    %c1_i32_136 = arith.constant 1 : i32
    %c17_i32 = arith.constant 17 : i32
    %c0_i32_137 = arith.constant 0 : i32
    %c0_i32_138 = arith.constant 0 : i32
    %172 = tpu.memref_slice %arg3[%c17_i32, %c0_i32_137, %c0_i32_138] : memref<25x128x128xbf16, #tpu.memory_space<any>> -> memref<5x128x128xbf16, #tpu.memory_space<any>>
    %c0_i32_139 = arith.constant 0 : i32
    %c0_i32_140 = arith.constant 0 : i32
    %c0_i32_141 = arith.constant 0 : i32
    %173 = tpu.memref_slice %arg5[%c1_i32_135, %c0_i32_139, %c0_i32_140, %c0_i32_141] : memref<2x6x128x128xbf16, #tpu.memory_space<vmem>> -> memref<1x5x128x128xbf16, #tpu.memory_space<vmem>>
    %174 = tpu.memref_squeeze %173 : memref<1x5x128x128xbf16, #tpu.memory_space<vmem>> -> memref<5x128x128xbf16, #tpu.memory_space<vmem>>
    %175 = tpu.memref_slice %arg6[%c1_i32_136] : memref<2x!tpu.dma_semaphore, #tpu.memory_space<semaphore_mem>> -> memref<1x!tpu.dma_semaphore, #tpu.memory_space<semaphore_mem>>
    %176 = tpu.memref_squeeze %175 : memref<1x!tpu.dma_semaphore, #tpu.memory_space<semaphore_mem>> -> memref<!tpu.dma_semaphore, #tpu.memory_space<semaphore_mem>>
    tpu.enqueue_dma source(%172 : memref<5x128x128xbf16, #tpu.memory_space<any>>) target(%174 : memref<5x128x128xbf16, #tpu.memory_space<vmem>>) target_semaphore(%176 : memref<!tpu.dma_semaphore, #tpu.memory_space<semaphore_mem>>)
    %177 = arith.truncf %151 : vector<8x128xf32> to vector<8x128xbf16>
    %c0_142 = arith.constant 0 : index
    %c0_143 = arith.constant 0 : index
    %c0_144 = arith.constant 0 : index
    %c0_145 = arith.constant 0 : index
    %178 = vector.load %arg5[%c0_142, %c0_143, %c0_144, %c0_145] : memref<2x6x128x128xbf16, #tpu.memory_space<vmem>>, vector<1x1x128x128xbf16>
    %179 = vector.shape_cast %178 : vector<1x1x128x128xbf16> to vector<128x128xbf16>
    %cst_146 = arith.constant dense<0.000000e+00> : vector<8x128xf32>
    %180 = tpu.matmul %177, %179, %cst_146 {dimension_numbers = #tpu.dot_dimension_numbers<[1], [0], [0], [1], [0, 0, 1, 1], [], []>} : vector<8x128xbf16>, vector<128x128xbf16>, vector<8x128xf32> -> vector<8x128xf32>
    %181 = arith.truncf %166 : vector<8x128xf32> to vector<8x128xbf16>
    %c0_147 = arith.constant 0 : index
    %c1_148 = arith.constant 1 : index
    %c0_149 = arith.constant 0 : index
    %c0_150 = arith.constant 0 : index
    %182 = vector.load %arg5[%c0_147, %c1_148, %c0_149, %c0_150] : memref<2x6x128x128xbf16, #tpu.memory_space<vmem>>, vector<1x1x128x128xbf16>
    %183 = vector.shape_cast %182 : vector<1x1x128x128xbf16> to vector<128x128xbf16>
    %cst_151 = arith.constant dense<0.000000e+00> : vector<8x128xf32>
    %184 = tpu.matmul %181, %183, %cst_151 {dimension_numbers = #tpu.dot_dimension_numbers<[1], [0], [0], [1], [0, 0, 1, 1], [], []>} : vector<8x128xbf16>, vector<128x128xbf16>, vector<8x128xf32> -> vector<8x128xf32>
    %185 = arith.addf %180, %184 : vector<8x128xf32>
    %c11 = arith.constant 11 : index
    %c0_152 = arith.constant 0 : index
    %186 = vector.load %arg2[%c11, %c0_152] : memref<25x128xf32, #tpu.memory_space<vmem>>, vector<1x128xf32>
    %187 = vector.broadcast %186 : vector<1x128xf32> to vector<8x128xf32>
    %188 = arith.addf %185, %187 : vector<8x128xf32>
    %cst_153 = arith.constant 5.000000e-01 : f32
    %189 = vector.broadcast %cst_153 : f32 to vector<8x128xf32>
    %190 = arith.mulf %189, %188 : vector<8x128xf32>
    %cst_154 = arith.constant 0.707106769 : f32
    %191 = vector.broadcast %cst_154 : f32 to vector<8x128xf32>
    %192 = arith.mulf %188, %191 : vector<8x128xf32>
    %193 = math.erf %192 : vector<8x128xf32>
    %cst_155 = arith.constant 1.000000e+00 : f32
    %194 = vector.broadcast %cst_155 : f32 to vector<8x128xf32>
    %195 = arith.addf %194, %193 : vector<8x128xf32>
    %196 = arith.mulf %190, %195 : vector<8x128xf32>
    %197 = arith.truncf %196 : vector<8x128xf32> to vector<8x128xbf16>
    %c0_156 = arith.constant 0 : index
    %c2_157 = arith.constant 2 : index
    %c0_158 = arith.constant 0 : index
    %c0_159 = arith.constant 0 : index
    %198 = vector.load %arg5[%c0_156, %c2_157, %c0_158, %c0_159] : memref<2x6x128x128xbf16, #tpu.memory_space<vmem>>, vector<1x1x128x128xbf16>
    %199 = vector.shape_cast %198 : vector<1x1x128x128xbf16> to vector<128x128xbf16>
    %cst_160 = arith.constant dense<0.000000e+00> : vector<8x128xf32>
    %200 = tpu.matmul %197, %199, %cst_160 {dimension_numbers = #tpu.dot_dimension_numbers<[1], [0], [0], [1], [0, 0, 1, 1], [], []>} : vector<8x128xbf16>, vector<128x128xbf16>, vector<8x128xf32> -> vector<8x128xf32>
    %c13 = arith.constant 13 : index
    %c0_161 = arith.constant 0 : index
    %201 = vector.load %arg2[%c13, %c0_161] : memref<25x128xf32, #tpu.memory_space<vmem>>, vector<1x128xf32>
    %202 = vector.broadcast %201 : vector<1x128xf32> to vector<8x128xf32>
    %203 = arith.addf %200, %202 : vector<8x128xf32>
    %204 = arith.truncf %203 : vector<8x128xf32> to vector<8x128xbf16>
    %c0_162 = arith.constant 0 : index
    %c3_163 = arith.constant 3 : index
    %c0_164 = arith.constant 0 : index
    %c0_165 = arith.constant 0 : index
    %205 = vector.load %arg5[%c0_162, %c3_163, %c0_164, %c0_165] : memref<2x6x128x128xbf16, #tpu.memory_space<vmem>>, vector<1x1x128x128xbf16>
    %206 = vector.shape_cast %205 : vector<1x1x128x128xbf16> to vector<128x128xbf16>
    %cst_166 = arith.constant dense<0.000000e+00> : vector<8x128xf32>
    %207 = tpu.matmul %204, %206, %cst_166 {dimension_numbers = #tpu.dot_dimension_numbers<[1], [0], [0], [1], [0, 0, 1, 1], [], []>} : vector<8x128xbf16>, vector<128x128xbf16>, vector<8x128xf32> -> vector<8x128xf32>
    %c14 = arith.constant 14 : index
    %c0_167 = arith.constant 0 : index
    %208 = vector.load %arg2[%c14, %c0_167] : memref<25x128xf32, #tpu.memory_space<vmem>>, vector<1x128xf32>
    %209 = vector.broadcast %208 : vector<1x128xf32> to vector<8x128xf32>
    %210 = arith.addf %207, %209 : vector<8x128xf32>
    %cst_168 = arith.constant 5.000000e-01 : f32
    %211 = vector.broadcast %cst_168 : f32 to vector<8x128xf32>
    %212 = arith.mulf %211, %210 : vector<8x128xf32>
    %cst_169 = arith.constant 0.707106769 : f32
    %213 = vector.broadcast %cst_169 : f32 to vector<8x128xf32>
    %214 = arith.mulf %210, %213 : vector<8x128xf32>
    %215 = math.erf %214 : vector<8x128xf32>
    %cst_170 = arith.constant 1.000000e+00 : f32
    %216 = vector.broadcast %cst_170 : f32 to vector<8x128xf32>
    %217 = arith.addf %216, %215 : vector<8x128xf32>
    %218 = arith.mulf %212, %217 : vector<8x128xf32>
    %219 = arith.truncf %218 : vector<8x128xf32> to vector<8x128xbf16>
    %c0_171 = arith.constant 0 : index
    %c4_172 = arith.constant 4 : index
    %c0_173 = arith.constant 0 : index
    %c0_174 = arith.constant 0 : index
    %220 = vector.load %arg5[%c0_171, %c4_172, %c0_173, %c0_174] : memref<2x6x128x128xbf16, #tpu.memory_space<vmem>>, vector<1x1x128x128xbf16>
    %221 = vector.shape_cast %220 : vector<1x1x128x128xbf16> to vector<128x128xbf16>
    %cst_175 = arith.constant dense<0.000000e+00> : vector<8x128xf32>
    %222 = tpu.matmul %219, %221, %cst_175 {dimension_numbers = #tpu.dot_dimension_numbers<[1], [0], [0], [1], [0, 0, 1, 1], [], []>} : vector<8x128xbf16>, vector<128x128xbf16>, vector<8x128xf32> -> vector<8x128xf32>
    %c15 = arith.constant 15 : index
    %c0_176 = arith.constant 0 : index
    %223 = vector.load %arg2[%c15, %c0_176] : memref<25x128xf32, #tpu.memory_space<vmem>>, vector<1x128xf32>
    %224 = vector.broadcast %223 : vector<1x128xf32> to vector<8x128xf32>
    %225 = arith.addf %222, %224 : vector<8x128xf32>
    %cst_177 = arith.constant 5.000000e-01 : f32
    %226 = vector.broadcast %cst_177 : f32 to vector<8x128xf32>
    %227 = arith.mulf %226, %225 : vector<8x128xf32>
    %cst_178 = arith.constant 0.707106769 : f32
    %228 = vector.broadcast %cst_178 : f32 to vector<8x128xf32>
    %229 = arith.mulf %225, %228 : vector<8x128xf32>
    %230 = math.erf %229 : vector<8x128xf32>
    %cst_179 = arith.constant 1.000000e+00 : f32
    %231 = vector.broadcast %cst_179 : f32 to vector<8x128xf32>
    %232 = arith.addf %231, %230 : vector<8x128xf32>
    %233 = arith.mulf %227, %232 : vector<8x128xf32>
    %234 = arith.truncf %233 : vector<8x128xf32> to vector<8x128xbf16>
    %c0_180 = arith.constant 0 : index
    %c5_181 = arith.constant 5 : index
    %c0_182 = arith.constant 0 : index
    %c0_183 = arith.constant 0 : index
    %235 = vector.load %arg5[%c0_180, %c5_181, %c0_182, %c0_183] : memref<2x6x128x128xbf16, #tpu.memory_space<vmem>>, vector<1x1x128x128xbf16>
    %236 = vector.shape_cast %235 : vector<1x1x128x128xbf16> to vector<128x128xbf16>
    %cst_184 = arith.constant dense<0.000000e+00> : vector<8x128xf32>
    %237 = tpu.matmul %234, %236, %cst_184 {dimension_numbers = #tpu.dot_dimension_numbers<[1], [0], [0], [1], [0, 0, 1, 1], [], []>} : vector<8x128xbf16>, vector<128x128xbf16>, vector<8x128xf32> -> vector<8x128xf32>
    %c16 = arith.constant 16 : index
    %c0_185 = arith.constant 0 : index
    %238 = vector.load %arg2[%c16, %c0_185] : memref<25x128xf32, #tpu.memory_space<vmem>>, vector<1x128xf32>
    %239 = vector.broadcast %238 : vector<1x128xf32> to vector<8x128xf32>
    %240 = arith.addf %237, %239 : vector<8x128xf32>
    %c1_i32_186 = arith.constant 1 : i32
    %c1_i32_187 = arith.constant 1 : i32
    %c17_i32_188 = arith.constant 17 : i32
    %c0_i32_189 = arith.constant 0 : i32
    %c0_i32_190 = arith.constant 0 : i32
    %241 = tpu.memref_slice %arg3[%c17_i32_188, %c0_i32_189, %c0_i32_190] : memref<25x128x128xbf16, #tpu.memory_space<any>> -> memref<5x128x128xbf16, #tpu.memory_space<any>>
    %c0_i32_191 = arith.constant 0 : i32
    %c0_i32_192 = arith.constant 0 : i32
    %c0_i32_193 = arith.constant 0 : i32
    %242 = tpu.memref_slice %arg5[%c1_i32_186, %c0_i32_191, %c0_i32_192, %c0_i32_193] : memref<2x6x128x128xbf16, #tpu.memory_space<vmem>> -> memref<1x5x128x128xbf16, #tpu.memory_space<vmem>>
    %243 = tpu.memref_squeeze %242 : memref<1x5x128x128xbf16, #tpu.memory_space<vmem>> -> memref<5x128x128xbf16, #tpu.memory_space<vmem>>
    %244 = tpu.memref_slice %arg6[%c1_i32_187] : memref<2x!tpu.dma_semaphore, #tpu.memory_space<semaphore_mem>> -> memref<1x!tpu.dma_semaphore, #tpu.memory_space<semaphore_mem>>
    %245 = tpu.memref_squeeze %244 : memref<1x!tpu.dma_semaphore, #tpu.memory_space<semaphore_mem>> -> memref<!tpu.dma_semaphore, #tpu.memory_space<semaphore_mem>>
    tpu.wait_dma2 semaphore(%245 : memref<!tpu.dma_semaphore, #tpu.memory_space<semaphore_mem>>) src(%241 : memref<5x128x128xbf16, #tpu.memory_space<any>>) dst(%243 : memref<5x128x128xbf16, #tpu.memory_space<vmem>>)
    %c0_i32_194 = arith.constant 0 : i32
    %c0_i32_195 = arith.constant 0 : i32
    %c22_i32 = arith.constant 22 : i32
    %c0_i32_196 = arith.constant 0 : i32
    %c0_i32_197 = arith.constant 0 : i32
    %246 = tpu.memref_slice %arg3[%c22_i32, %c0_i32_196, %c0_i32_197] : memref<25x128x128xbf16, #tpu.memory_space<any>> -> memref<3x128x128xbf16, #tpu.memory_space<any>>
    %c0_i32_198 = arith.constant 0 : i32
    %c0_i32_199 = arith.constant 0 : i32
    %c0_i32_200 = arith.constant 0 : i32
    %247 = tpu.memref_slice %arg5[%c0_i32_194, %c0_i32_198, %c0_i32_199, %c0_i32_200] : memref<2x6x128x128xbf16, #tpu.memory_space<vmem>> -> memref<1x3x128x128xbf16, #tpu.memory_space<vmem>>
    %248 = tpu.memref_squeeze %247 : memref<1x3x128x128xbf16, #tpu.memory_space<vmem>> -> memref<3x128x128xbf16, #tpu.memory_space<vmem>>
    %249 = tpu.memref_slice %arg6[%c0_i32_195] : memref<2x!tpu.dma_semaphore, #tpu.memory_space<semaphore_mem>> -> memref<1x!tpu.dma_semaphore, #tpu.memory_space<semaphore_mem>>
    %250 = tpu.memref_squeeze %249 : memref<1x!tpu.dma_semaphore, #tpu.memory_space<semaphore_mem>> -> memref<!tpu.dma_semaphore, #tpu.memory_space<semaphore_mem>>
    tpu.enqueue_dma source(%246 : memref<3x128x128xbf16, #tpu.memory_space<any>>) target(%248 : memref<3x128x128xbf16, #tpu.memory_space<vmem>>) target_semaphore(%250 : memref<!tpu.dma_semaphore, #tpu.memory_space<semaphore_mem>>)
    %251 = arith.truncf %240 : vector<8x128xf32> to vector<8x128xbf16>
    %c1_201 = arith.constant 1 : index
    %c0_202 = arith.constant 0 : index
    %c0_203 = arith.constant 0 : index
    %c0_204 = arith.constant 0 : index
    %252 = vector.load %arg5[%c1_201, %c0_202, %c0_203, %c0_204] : memref<2x6x128x128xbf16, #tpu.memory_space<vmem>>, vector<1x1x128x128xbf16>
    %253 = vector.shape_cast %252 : vector<1x1x128x128xbf16> to vector<128x128xbf16>
    %cst_205 = arith.constant dense<0.000000e+00> : vector<8x128xf32>
    %254 = tpu.matmul %251, %253, %cst_205 {dimension_numbers = #tpu.dot_dimension_numbers<[1], [0], [0], [1], [0, 0, 1, 1], [], []>} : vector<8x128xbf16>, vector<128x128xbf16>, vector<8x128xf32> -> vector<8x128xf32>
    %c17 = arith.constant 17 : index
    %c0_206 = arith.constant 0 : index
    %255 = vector.load %arg2[%c17, %c0_206] : memref<25x128xf32, #tpu.memory_space<vmem>>, vector<1x128xf32>
    %256 = vector.broadcast %255 : vector<1x128xf32> to vector<8x128xf32>
    %257 = arith.addf %254, %256 : vector<8x128xf32>
    %cst_207 = arith.constant 5.000000e-01 : f32
    %258 = vector.broadcast %cst_207 : f32 to vector<8x128xf32>
    %259 = arith.mulf %258, %257 : vector<8x128xf32>
    %cst_208 = arith.constant 0.707106769 : f32
    %260 = vector.broadcast %cst_208 : f32 to vector<8x128xf32>
    %261 = arith.mulf %257, %260 : vector<8x128xf32>
    %262 = math.erf %261 : vector<8x128xf32>
    %cst_209 = arith.constant 1.000000e+00 : f32
    %263 = vector.broadcast %cst_209 : f32 to vector<8x128xf32>
    %264 = arith.addf %263, %262 : vector<8x128xf32>
    %265 = arith.mulf %259, %264 : vector<8x128xf32>
    %266 = arith.truncf %265 : vector<8x128xf32> to vector<8x128xbf16>
    %c1_210 = arith.constant 1 : index
    %c1_211 = arith.constant 1 : index
    %c0_212 = arith.constant 0 : index
    %c0_213 = arith.constant 0 : index
    %267 = vector.load %arg5[%c1_210, %c1_211, %c0_212, %c0_213] : memref<2x6x128x128xbf16, #tpu.memory_space<vmem>>, vector<1x1x128x128xbf16>
    %268 = vector.shape_cast %267 : vector<1x1x128x128xbf16> to vector<128x128xbf16>
    %cst_214 = arith.constant dense<0.000000e+00> : vector<8x128xf32>
    %269 = tpu.matmul %266, %268, %cst_214 {dimension_numbers = #tpu.dot_dimension_numbers<[1], [0], [0], [1], [0, 0, 1, 1], [], []>} : vector<8x128xbf16>, vector<128x128xbf16>, vector<8x128xf32> -> vector<8x128xf32>
    %c18 = arith.constant 18 : index
    %c0_215 = arith.constant 0 : index
    %270 = vector.load %arg2[%c18, %c0_215] : memref<25x128xf32, #tpu.memory_space<vmem>>, vector<1x128xf32>
    %271 = vector.broadcast %270 : vector<1x128xf32> to vector<8x128xf32>
    %272 = arith.addf %269, %271 : vector<8x128xf32>
    %cst_216 = arith.constant 5.000000e-01 : f32
    %273 = vector.broadcast %cst_216 : f32 to vector<8x128xf32>
    %274 = arith.mulf %273, %272 : vector<8x128xf32>
    %cst_217 = arith.constant 0.707106769 : f32
    %275 = vector.broadcast %cst_217 : f32 to vector<8x128xf32>
    %276 = arith.mulf %272, %275 : vector<8x128xf32>
    %277 = math.erf %276 : vector<8x128xf32>
    %cst_218 = arith.constant 1.000000e+00 : f32
    %278 = vector.broadcast %cst_218 : f32 to vector<8x128xf32>
    %279 = arith.addf %278, %277 : vector<8x128xf32>
    %280 = arith.mulf %274, %279 : vector<8x128xf32>
    %281 = arith.truncf %280 : vector<8x128xf32> to vector<8x128xbf16>
    %c1_219 = arith.constant 1 : index
    %c2_220 = arith.constant 2 : index
    %c0_221 = arith.constant 0 : index
    %c0_222 = arith.constant 0 : index
    %282 = vector.load %arg5[%c1_219, %c2_220, %c0_221, %c0_222] : memref<2x6x128x128xbf16, #tpu.memory_space<vmem>>, vector<1x1x128x128xbf16>
    %283 = vector.shape_cast %282 : vector<1x1x128x128xbf16> to vector<128x128xbf16>
    %cst_223 = arith.constant dense<0.000000e+00> : vector<8x128xf32>
    %284 = tpu.matmul %281, %283, %cst_223 {dimension_numbers = #tpu.dot_dimension_numbers<[1], [0], [0], [1], [0, 0, 1, 1], [], []>} : vector<8x128xbf16>, vector<128x128xbf16>, vector<8x128xf32> -> vector<8x128xf32>
    %c19 = arith.constant 19 : index
    %c0_224 = arith.constant 0 : index
    %285 = vector.load %arg2[%c19, %c0_224] : memref<25x128xf32, #tpu.memory_space<vmem>>, vector<1x128xf32>
    %286 = vector.broadcast %285 : vector<1x128xf32> to vector<8x128xf32>
    %287 = arith.addf %284, %286 : vector<8x128xf32>
    %288 = arith.truncf %287 : vector<8x128xf32> to vector<8x128xbf16>
    %c1_225 = arith.constant 1 : index
    %c3_226 = arith.constant 3 : index
    %c0_227 = arith.constant 0 : index
    %c0_228 = arith.constant 0 : index
    %289 = vector.load %arg5[%c1_225, %c3_226, %c0_227, %c0_228] : memref<2x6x128x128xbf16, #tpu.memory_space<vmem>>, vector<1x1x128x128xbf16>
    %290 = vector.shape_cast %289 : vector<1x1x128x128xbf16> to vector<128x128xbf16>
    %cst_229 = arith.constant dense<0.000000e+00> : vector<8x128xf32>
    %291 = tpu.matmul %288, %290, %cst_229 {dimension_numbers = #tpu.dot_dimension_numbers<[1], [0], [0], [1], [0, 0, 1, 1], [], []>} : vector<8x128xbf16>, vector<128x128xbf16>, vector<8x128xf32> -> vector<8x128xf32>
    %c20 = arith.constant 20 : index
    %c0_230 = arith.constant 0 : index
    %292 = vector.load %arg2[%c20, %c0_230] : memref<25x128xf32, #tpu.memory_space<vmem>>, vector<1x128xf32>
    %293 = vector.broadcast %292 : vector<1x128xf32> to vector<8x128xf32>
    %294 = arith.addf %291, %293 : vector<8x128xf32>
    %cst_231 = arith.constant 5.000000e-01 : f32
    %295 = vector.broadcast %cst_231 : f32 to vector<8x128xf32>
    %296 = arith.mulf %295, %294 : vector<8x128xf32>
    %cst_232 = arith.constant 0.707106769 : f32
    %297 = vector.broadcast %cst_232 : f32 to vector<8x128xf32>
    %298 = arith.mulf %294, %297 : vector<8x128xf32>
    %299 = math.erf %298 : vector<8x128xf32>
    %cst_233 = arith.constant 1.000000e+00 : f32
    %300 = vector.broadcast %cst_233 : f32 to vector<8x128xf32>
    %301 = arith.addf %300, %299 : vector<8x128xf32>
    %302 = arith.mulf %296, %301 : vector<8x128xf32>
    %303 = arith.truncf %302 : vector<8x128xf32> to vector<8x128xbf16>
    %c1_234 = arith.constant 1 : index
    %c4_235 = arith.constant 4 : index
    %c0_236 = arith.constant 0 : index
    %c0_237 = arith.constant 0 : index
    %304 = vector.load %arg5[%c1_234, %c4_235, %c0_236, %c0_237] : memref<2x6x128x128xbf16, #tpu.memory_space<vmem>>, vector<1x1x128x128xbf16>
    %305 = vector.shape_cast %304 : vector<1x1x128x128xbf16> to vector<128x128xbf16>
    %cst_238 = arith.constant dense<0.000000e+00> : vector<8x128xf32>
    %306 = tpu.matmul %303, %305, %cst_238 {dimension_numbers = #tpu.dot_dimension_numbers<[1], [0], [0], [1], [0, 0, 1, 1], [], []>} : vector<8x128xbf16>, vector<128x128xbf16>, vector<8x128xf32> -> vector<8x128xf32>
    %c21 = arith.constant 21 : index
    %c0_239 = arith.constant 0 : index
    %307 = vector.load %arg2[%c21, %c0_239] : memref<25x128xf32, #tpu.memory_space<vmem>>, vector<1x128xf32>
    %308 = vector.broadcast %307 : vector<1x128xf32> to vector<8x128xf32>
    %309 = arith.addf %306, %308 : vector<8x128xf32>
    %cst_240 = arith.constant 5.000000e-01 : f32
    %310 = vector.broadcast %cst_240 : f32 to vector<8x128xf32>
    %311 = arith.mulf %310, %309 : vector<8x128xf32>
    %cst_241 = arith.constant 0.707106769 : f32
    %312 = vector.broadcast %cst_241 : f32 to vector<8x128xf32>
    %313 = arith.mulf %309, %312 : vector<8x128xf32>
    %314 = math.erf %313 : vector<8x128xf32>
    %cst_242 = arith.constant 1.000000e+00 : f32
    %315 = vector.broadcast %cst_242 : f32 to vector<8x128xf32>
    %316 = arith.addf %315, %314 : vector<8x128xf32>
    %317 = arith.mulf %311, %316 : vector<8x128xf32>
    %c0_i32_243 = arith.constant 0 : i32
    %c0_i32_244 = arith.constant 0 : i32
    %c22_i32_245 = arith.constant 22 : i32
    %c0_i32_246 = arith.constant 0 : i32
    %c0_i32_247 = arith.constant 0 : i32
    %318 = tpu.memref_slice %arg3[%c22_i32_245, %c0_i32_246, %c0_i32_247] : memref<25x128x128xbf16, #tpu.memory_space<any>> -> memref<3x128x128xbf16, #tpu.memory_space<any>>
    %c0_i32_248 = arith.constant 0 : i32
    %c0_i32_249 = arith.constant 0 : i32
    %c0_i32_250 = arith.constant 0 : i32
    %319 = tpu.memref_slice %arg5[%c0_i32_243, %c0_i32_248, %c0_i32_249, %c0_i32_250] : memref<2x6x128x128xbf16, #tpu.memory_space<vmem>> -> memref<1x3x128x128xbf16, #tpu.memory_space<vmem>>
    %320 = tpu.memref_squeeze %319 : memref<1x3x128x128xbf16, #tpu.memory_space<vmem>> -> memref<3x128x128xbf16, #tpu.memory_space<vmem>>
    %321 = tpu.memref_slice %arg6[%c0_i32_244] : memref<2x!tpu.dma_semaphore, #tpu.memory_space<semaphore_mem>> -> memref<1x!tpu.dma_semaphore, #tpu.memory_space<semaphore_mem>>
    %322 = tpu.memref_squeeze %321 : memref<1x!tpu.dma_semaphore, #tpu.memory_space<semaphore_mem>> -> memref<!tpu.dma_semaphore, #tpu.memory_space<semaphore_mem>>
    tpu.wait_dma2 semaphore(%322 : memref<!tpu.dma_semaphore, #tpu.memory_space<semaphore_mem>>) src(%318 : memref<3x128x128xbf16, #tpu.memory_space<any>>) dst(%320 : memref<3x128x128xbf16, #tpu.memory_space<vmem>>)
    %323 = arith.truncf %317 : vector<8x128xf32> to vector<8x128xbf16>
    %c0_251 = arith.constant 0 : index
    %c0_252 = arith.constant 0 : index
    %c0_253 = arith.constant 0 : index
    %c0_254 = arith.constant 0 : index
    %324 = vector.load %arg5[%c0_251, %c0_252, %c0_253, %c0_254] : memref<2x6x128x128xbf16, #tpu.memory_space<vmem>>, vector<1x1x128x128xbf16>
    %325 = vector.shape_cast %324 : vector<1x1x128x128xbf16> to vector<128x128xbf16>
    %cst_255 = arith.constant dense<0.000000e+00> : vector<8x128xf32>
    %326 = tpu.matmul %323, %325, %cst_255 {dimension_numbers = #tpu.dot_dimension_numbers<[1], [0], [0], [1], [0, 0, 1, 1], [], []>} : vector<8x128xbf16>, vector<128x128xbf16>, vector<8x128xf32> -> vector<8x128xf32>
    %c22 = arith.constant 22 : index
    %c0_256 = arith.constant 0 : index
    %327 = vector.load %arg2[%c22, %c0_256] : memref<25x128xf32, #tpu.memory_space<vmem>>, vector<1x128xf32>
    %328 = vector.broadcast %327 : vector<1x128xf32> to vector<8x128xf32>
    %329 = arith.addf %326, %328 : vector<8x128xf32>
    %330 = arith.truncf %329 : vector<8x128xf32> to vector<8x128xbf16>
    %c0_257 = arith.constant 0 : index
    %c1_258 = arith.constant 1 : index
    %c0_259 = arith.constant 0 : index
    %c0_260 = arith.constant 0 : index
    %331 = vector.load %arg5[%c0_257, %c1_258, %c0_259, %c0_260] : memref<2x6x128x128xbf16, #tpu.memory_space<vmem>>, vector<1x1x128x128xbf16>
    %332 = vector.shape_cast %331 : vector<1x1x128x128xbf16> to vector<128x128xbf16>
    %cst_261 = arith.constant dense<0.000000e+00> : vector<8x128xf32>
    %333 = tpu.matmul %330, %332, %cst_261 {dimension_numbers = #tpu.dot_dimension_numbers<[1], [0], [0], [1], [0, 0, 1, 1], [], []>} : vector<8x128xbf16>, vector<128x128xbf16>, vector<8x128xf32> -> vector<8x128xf32>
    %c23 = arith.constant 23 : index
    %c0_262 = arith.constant 0 : index
    %334 = vector.load %arg2[%c23, %c0_262] : memref<25x128xf32, #tpu.memory_space<vmem>>, vector<1x128xf32>
    %335 = vector.broadcast %334 : vector<1x128xf32> to vector<8x128xf32>
    %336 = arith.addf %333, %335 : vector<8x128xf32>
    %337 = arith.truncf %336 : vector<8x128xf32> to vector<8x128xbf16>
    %c0_263 = arith.constant 0 : index
    %c2_264 = arith.constant 2 : index
    %c0_265 = arith.constant 0 : index
    %c0_266 = arith.constant 0 : index
    %338 = vector.load %arg5[%c0_263, %c2_264, %c0_265, %c0_266] : memref<2x6x128x128xbf16, #tpu.memory_space<vmem>>, vector<1x1x128x128xbf16>
    %339 = vector.shape_cast %338 : vector<1x1x128x128xbf16> to vector<128x128xbf16>
    %cst_267 = arith.constant dense<0.000000e+00> : vector<8x128xf32>
    %340 = tpu.matmul %337, %339, %cst_267 {dimension_numbers = #tpu.dot_dimension_numbers<[1], [0], [0], [1], [0, 0, 1, 1], [], []>} : vector<8x128xbf16>, vector<128x128xbf16>, vector<8x128xf32> -> vector<8x128xf32>
    %c24 = arith.constant 24 : index
    %c0_268 = arith.constant 0 : index
    %341 = vector.load %arg2[%c24, %c0_268] : memref<25x128xf32, #tpu.memory_space<vmem>>, vector<1x128xf32>
    %342 = vector.broadcast %341 : vector<1x128xf32> to vector<8x128xf32>
    %343 = arith.addf %340, %342 : vector<8x128xf32>
    %344 = vector.extract_strided_slice %343 {offsets = [0, 0], sizes = [8, 1], strides = [1, 1]} : vector<8x128xf32> to vector<8x1xf32>
    %cst_269 = arith.constant 0.000000e+00 : f32
    %345 = vector.broadcast %cst_269 : f32 to vector<8x1xf32>
    %346 = arith.subf %345, %344 : vector<8x1xf32>
    %347 = math.exp %346 : vector<8x1xf32>
    %cst_270 = arith.constant 1.000000e+00 : f32
    %348 = vector.broadcast %cst_270 : f32 to vector<8x1xf32>
    %349 = arith.addf %348, %347 : vector<8x1xf32>
    %350 = tpu.reciprocal %349 {approx = true} : vector<8x1xf32> -> vector<8x1xf32>
    %c0_271 = arith.constant 0 : index
    %c0_272 = arith.constant 0 : index
    %351 = vector.load %arg4[%c0_271, %c0_272] : memref<8x1xf32, #tpu.memory_space<vmem>>, vector<8x1xf32>
    tpu.vector_store %arg4[%c0_271, %c0_272], %350 {strides = array<i32>} : memref<8x1xf32, #tpu.memory_space<vmem>>, vector<8x1xf32>,
    return
  }
  func.func @transform_0(%arg0: i32) -> (i32, i32) {
    %c0_i32 = arith.constant 0 : i32
    %c0_i32_0 = arith.constant 0 : i32
    %c0_i32_1 = arith.constant 0 : i32
    return %c0_i32, %c0_i32_0 : i32, i32
  }
  func.func @transform_1(%arg0: i32) -> (i32, i32) {
    %c0_i32 = arith.constant 0 : i32
    %c0_i32_0 = arith.constant 0 : i32
    %c0_i32_1 = arith.constant 0 : i32
    return %c0_i32, %c0_i32_0 : i32, i32
  }
  func.func @transform_3(%arg0: i32) -> (i32, i32) {
    %c0_i32 = arith.constant 0 : i32
    %c0_i32_0 = arith.constant 0 : i32
    %c0_i32_1 = arith.constant 0 : i32
    return %c0_i32, %c0_i32_0 : i32, i32
  }
}

</mosaic_0001>

<bundles_post_ra>
// kernel: neuralnet_forward.1
= control target key start
LH: loop header
LB: loop body
LE: loop exit
PB: predicated region body
PF: predicated region fallthrough
CT: control target
= control target key end

     0   :  { %8 = vsyncpa [#allocation5], 0  ;;  %s4048_s15 = smov [#allocation4]   ;;  %s4049_s17 = smov 128   ;;  %s4148_s0 = inlined_call_operand.vmem [shape: f32[8,128], index: 0, kind: input, shape index: {}]   ;;  %s4149_s1 = inlined_call_operand.hbm [shape: f32[25,128], index: 1, kind: input, shape index: {}]   ;;  %s4150_s2 = inlined_call_operand.hbm [shape: bf16[25,128,128], index: 2, kind: input, shape index: {}]   ;;  %s4151_s3 = inlined_call_operand.vmem [shape: f32[8,1], index: 3, kind: output, shape index: {}]  }
   0x1   :  { %s15_s14 = sshll.u32 %s4149_s1, 4  ;;  %s17_s16 = sshll.u32 %s4048_s15, 4  ;;  %s16_s14 = int_to_ptr.hbm [resolvable:$true] %s15_s14  ;;  %s18_s16 = int_to_ptr.vmem [resolvable:$true] %s17_s16 }
   0x2   :  { %s4050_s18 = smov 8  }
   0x3   :  { %23 = dma.hbm_to_vmem [thread:$0]  %s16_s14, 512, %s18_s16, [#allocation5], %s4049_s17, %s4049_s17, %s4050_s18  }
   0x4   :  { %4036 = dma.done.wait [#allocation5], 512  }
   0x5   :  { %4037 = vsyncadd [#allocation5], 4294966784  ;;  %s35_s21 = sshll.u32 %s4150_s2, 4  ;;  %s4051_s22 = smov [#allocation2]   ;;  %v41_v0 = vld [vmem:[%s4148_s0] sm:$0xff]  ;;  %s36_s21 = int_to_ptr.hbm [resolvable:$true] %s35_s21 }
   0x6   :  { %s37_s23 = sshll.u32 %s4051_s22, 4  ;;  %s4079_s23 = int_to_ptr.vmem [resolvable:$true] %s37_s23 }
   0x7   :  { %40 = dma.hbm_to_vmem [thread:$0]  %s36_s21, 5120, %s4079_s23, [#allocation3] }
   0x8   :  { %4038 = dma.done.wait [#allocation3], 5120 }
   0x9   :  { %4039 = vsyncadd [#allocation3], 4294962176  ;;  %s47_s27 = scalar_lea.hbm %s4150_s2, 320  ;;  %s4052_s29 = smov [#allocation2 + $0x180]   ;;  %v63_v9 = vpack.c.bf16 %v41_v0, %v41_v0  ;;  %v3834_v12 = vld [vmem:[#allocation4] ss:$0 sm:$0xff] }
   0xa   :  { %s57_s28 = sshll.u32 %s47_s27, 4  ;;  %s4088_s30 = sshll.u32 %s4052_s29, 4  ;;  %v3835_v0 = vld [vmem:[#allocation4 + $0x1] ss:$0 sm:$0xff]  ;;  %s58_s28 = int_to_ptr.hbm [resolvable:$true] %s57_s28  ;;  %s60_s30 = int_to_ptr.vmem [resolvable:$true] %s4088_s30 }
   0xb   :  { %62 = dma.hbm_to_vmem [thread:$0]  %s58_s28, 6144, %s60_s30, [#allocation3 + $0x1] }
   0xc   :  { %v3636_v1 = vld [vmem:[#allocation2 + $0x38] sm:$0xff]  ;;  %v3635_v2 = vld [vmem:[#allocation2 + $0x30] sm:$0xff]  ;;  %v3634_v3 = vld [vmem:[#allocation2 + $0x28] sm:$0xff] }
   0xd   :  { %130 = vmatpush.bf16.msra.mxu0 %v3636_v1  ;;  %v3633_v4 = vld [vmem:[#allocation2 + $0x20] sm:$0xff]  ;;  %v3632_v5 = vld [vmem:[#allocation2 + $0x18] sm:$0xff]  ;;  %v3631_v6 = vld [vmem:[#allocation2 + $0x10] sm:$0xff] }
   0xe   :  { %v3630_v7 = vld [vmem:[#allocation2 + $0x8] sm:$0xff]  ;;  %v3629_v8 = vld [vmem:[#allocation2] sm:$0xff]  ;;  %v3644_v10 = vld [vmem:[#allocation2 + $0x78] sm:$0xff] }
   0xf   :  { %255 = vmatpush.bf16.msra.mxu1 %v3644_v10  ;;  %v3643_v11 = vld [vmem:[#allocation2 + $0x70] sm:$0xff]  ;;  %v3642_v13 = vld [vmem:[#allocation2 + $0x68] sm:$0xff]  ;;  %v3641_v16 = vld [vmem:[#allocation2 + $0x60] sm:$0xff] }
  0x10   :  { %v3640_v19 = vld [vmem:[#allocation2 + $0x58] sm:$0xff]  ;;  %v3639_v23 = vld [vmem:[#allocation2 + $0x50] sm:$0xff]  ;;  %v3638_v28 = vld [vmem:[#allocation2 + $0x48] sm:$0xff] }
  0x11   :  { %131 = vmatpush.bf16.msra.mxu0 %v3635_v2  ;;  %v3637_v32 = vld [vmem:[#allocation2 + $0x40] sm:$0xff]  ;;  %v3652_v62 = vld [vmem:[#allocation2 + $0xb8] sm:$0xff]  ;;  %v3651_v63 = vld [vmem:[#allocation2 + $0xb0] sm:$0xff] }
  0x12   :  { %380 = vmatpush.bf16.msra.mxu2 %v3652_v62  ;;  %v3650_v1 = vld [vmem:[#allocation2 + $0xa8] sm:$0xff] }
  0x13   :  { %256 = vmatpush.bf16.msra.mxu1 %v3643_v11 }
  0x15   :  { %132 = vmatpush.bf16.msra.mxu0 %v3634_v3 }
  0x16   :  { %381 = vmatpush.bf16.msra.mxu2 %v3651_v63  ;;  %v3668_v63 = vld [vmem:[#allocation2 + $0x138] sm:$0xff] }
  0x17   :  { %257 = vmatpush.bf16.msra.mxu1 %v3642_v13 }
  0x19   :  { %133 = vmatpush.bf16.msra.mxu0 %v3633_v4  ;;  %v3649_v4 = vld [vmem:[#allocation2 + $0xa0] sm:$0xff] }
  0x1a   :  { %382 = vmatpush.bf16.msra.mxu2 %v3650_v1  ;;  %v3837_v1 = vld [vmem:[#allocation4 + $0x3] ss:$0 sm:$0xff] }
  0x1b   :  { %258 = vmatpush.bf16.msra.mxu1 %v3641_v16 }
  0x1d   :  { %134 = vmatpush.bf16.msra.mxu0 %v3632_v5 }
  0x1e   :  { %383 = vmatpush.bf16.msra.mxu2 %v3649_v4 }
  0x1f   :  { %259 = vmatpush.bf16.msra.mxu1 %v3640_v19 }
  0x21   :  { %135 = vmatpush.bf16.msra.mxu0 %v3631_v6 }
  0x23   :  { %260 = vmatpush.bf16.msra.mxu1 %v3639_v23 }
  0x25   :  { %136 = vmatpush.bf16.msra.mxu0 %v3630_v7  ;;  %v3648_v7 = vld [vmem:[#allocation2 + $0x98] sm:$0xff] }
  0x26   :  { %384 = vmatpush.bf16.msra.mxu2 %v3648_v7 }
  0x27   :  { %261 = vmatpush.bf16.msra.mxu1 %v3638_v28 }
  0x29   :  { %137 = vmatpush.bf16.msra.mxu0 %v3629_v8 }
  0x2b   :  { %262 = vmatpush.bf16.msra.mxu1 %v3637_v32  ;;  %v3658_v32 = vld [vmem:[#allocation2 + $0xe8] sm:$0xff] }
  0x2c   :  { %138 = vmatmul.bf16.vlgmr.msra.gmra.mxu0 %v63_v9 }
  0x2d   :  { %586 = vmatpush.bf16.msrb.mxu0 %v3668_v63 }
  0xa9   :  { %v139_v14 = vpop.f32.mrf.mxu0 }
  0xaa   :  { %v140_v15 = vadd.f32 %v3834_v12, %v139_v14  ;;  %v3647_v12 = vld [vmem:[#allocation2 + $0x90] sm:$0xff] }
  0xab   :  { %385 = vmatpush.bf16.msra.mxu2 %v3647_v12 }
  0xac   :  { %v144_v17 = vmul.f32 0.70710677, %v140_v15  ;;  %v143_v58 = vmul.f32 0.5, %v140_v15 }
  0xae   :  { %v145_v18 = vmul.f32 %v144_v17, %v144_v17 }
  0xb0   :  { %v146_v20 = vmin.f32 %v145_v18, 16.0 }
  0xb1   :  { %v141_v21 = vpop.f32.mrf.mxu0 }
  0xb2   :  { %v147_v22 = vmul.f32 2.1237322e-06, %v146_v20  ;;  %v158_v24 = vmul.f32 3.8918573e-05, %v146_v20  ;;  %v3645_v21 = vld [vmem:[#allocation2 + $0x80] sm:$0xff] }
  0xb4   :  { %v148_v25 = vadd.f32 0.00028619796, %v147_v22  ;;  %v159_v26 = vadd.f32 0.001143296, %v158_v24 }
  0xb6   :  { %v149_v27 = vmul.f32 %v148_v25, %v146_v20  ;;  %v160_v29 = vmul.f32 %v159_v26, %v146_v20 }
  0xb8   :  { %v161_v30 = vadd.f32 0.014752088, %v160_v29  ;;  %v150_v31 = vadd.f32 0.0036580483, %v149_v27  ;;  %v3660_v27 = vld [vmem:[#allocation2 + $0xf8] sm:$0xff]  ;;  %v3659_v29 = vld [vmem:[#allocation2 + $0xf0] sm:$0xff] }
  0xb9   :  { %461 = vmatpush.bf16.msra.mxu3 %v3660_v27 }
  0xba   :  { %v162_v33 = vmul.f32 %v161_v30, %v146_v20  ;;  %v151_v35 = vmul.f32 %v150_v31, %v146_v20 }
  0xbc   :  { %v163_v34 = vadd.f32 0.112945676, %v162_v33  ;;  %v152_v38 = vadd.f32 0.05243302, %v151_v35 }
  0xbd   :  { %462 = vmatpush.bf16.msra.mxu3 %v3659_v29 }
  0xbe   :  { %v164_v36 = vmul.f32 %v163_v34, %v146_v20  ;;  %v153_v41 = vmul.f32 %v152_v38, %v146_v20  ;;  %v3657_v34 = vld [vmem:[#allocation2 + $0xe0] sm:$0xff] }
  0xc0   :  { %v165_v37 = vadd.f32 0.4994258, %v164_v36  ;;  %v154_v42 = vadd.f32 0.18741608, %v153_v41 }
  0xc1   :  { %463 = vmatpush.bf16.msra.mxu3 %v3658_v32 }
  0xc2   :  { %v166_v39 = vmul.f32 %v165_v37, %v146_v20  ;;  %v155_v44 = vmul.f32 %v154_v42, %v146_v20 }
  0xc4   :  { %v167_v40 = vadd.f32 1.0, %v166_v39  ;;  %v156_v48 = vadd.f32 1.1283791, %v155_v44  ;;  %v3656_v39 = vld [vmem:[#allocation2 + $0xd8] sm:$0xff] }
  0xc5   :  { %464 = vmatpush.bf16.msra.mxu3 %v3657_v34 }
  0xc6   :  { %3839 = vrcp.f32 %v167_v40  ;;  %v179_v47 = vand.u32 2147483648, %v167_v40  ;;  %v177_v50 = vand.u32 2147483647, %v167_v40  ;;  %vm173_vm1 = vweird.f32 %v167_v40 }
  0xc7   :  { %v157_v53 = vmul.f32 %v156_v48, %v144_v17  ;;  %v3646_v17 = vld [vmem:[#allocation2 + $0x88] sm:$0xff] }
  0xc8   :  { %v180_v52 = vor.u32 1.1754944e-38, %v179_v47  ;;  %vm178_vm3 = vcmp.eq.f32.partialorder %v177_v50, 8.507059e+37  ;;  %386 = vmatpush.bf16.msra.mxu2 %v3646_v17 }
  0xc9   :  { %465 = vmatpush.bf16.msra.mxu3 %v3656_v39 }
  0xcc   :  { %v3840_v43 = vpop.eup %3839  ;;  %387 = vmatpush.bf16.msra.mxu2 %v3645_v21 }
  0xcd   :  { %v169_v45 = vmul.f32 %v3840_v43, %v167_v40  ;;  %vm174_vm0 = vweird.f32 %v3840_v43 }
  0xce   :  { %vm175_vm2 = vmor %vm173_vm1, %vm174_vm0 }
  0xcf   :  { %v170_v46 = vsub.f32 1.0, %v169_v45  ;;  %v3655_v45 = vld [vmem:[#allocation2 + $0xd0] sm:$0xff] }
  0xd0   :  { %466 = vmatpush.bf16.msra.mxu3 %v3655_v45 }
  0xd1   :  { %v171_v49 = vmul.f32 %v3840_v43, %v170_v46 }
  0xd3   :  { %v172_v51 = vadd.f32 %v3840_v43, %v171_v49 }
  0xd5   :  { %v176_v54 = vsel %vm175_vm2, %v3840_v43, %v172_v51  ;;  %v3654_v51 = vld [vmem:[#allocation2 + $0xc8] sm:$0xff] }
  0xd6   :  { %v181_v55 = vsel %vm178_vm3, %v180_v52, %v176_v54  ;;  %467 = vmatpush.bf16.msra.mxu3 %v3654_v51  ;;  %v3838_v51 = vld [vmem:[#allocation4 + $0x4] ss:$0 sm:$0xff] }
  0xd7   :  { %v182_v56 = vmul.f32 %v181_v55, %v157_v53 }
  0xd9   :  { %v2844_v57 = vclamps-f32 %v182_v56, 1.0 }
  0xdb   :  { %v185_v59 = vadd.f32 1.0, %v2844_v57  ;;  %v3653_v57 = vld [vmem:[#allocation2 + $0xc0] sm:$0xff] }
  0xdc   :  { %468 = vmatpush.bf16.msra.mxu3 %v3653_v57 }
  0xdd   :  { %v186_v60 = vmul.f32 %v185_v59, %v143_v58  ;;  %v3836_v58 = vld [vmem:[#allocation4 + $0x2] ss:$0 sm:$0xff] }
  0xdf   :  { %v187_v61 = vpack.c.bf16 %v186_v60, %v186_v60 }
  0xe1   :  { %263 = vmatmul.bf16.vlgmr.msra.gmra.mxu1 %v187_v61 }
 0x15e   :  { %v264_v2 = vpop.f32.mrf.mxu1 }
 0x15f   :  { %v4093_v3 = vadd.f32 %v3835_v0, %v264_v2  ;;  %v3667_v0 = vld [vmem:[#allocation2 + $0x130] sm:$0xff] }
 0x160   :  { %587 = vmatpush.bf16.msrb.mxu0 %v3667_v0 }
 0x161   :  { %v269_v5 = vmul.f32 0.70710677, %v4093_v3  ;;  %v268_v53 = vmul.f32 0.5, %v4093_v3  ;;  %v3666_v3 = vld [vmem:[#allocation2 + $0x128] sm:$0xff] }
 0x163   :  { %v270_v6 = vmul.f32 %v269_v5, %v269_v5 }
 0x164   :  { %588 = vmatpush.bf16.msrb.mxu0 %v3666_v3 }
 0x165   :  { %v271_v8 = vmin.f32 %v270_v6, 16.0  ;;  %v3665_v6 = vld [vmem:[#allocation2 + $0x120] sm:$0xff] }
 0x166   :  { %v266_v9 = vpop.f32.mrf.mxu1 }
 0x167   :  { %v272_v10 = vmul.f32 2.1237322e-06, %v271_v8  ;;  %v283_v11 = vmul.f32 3.8918573e-05, %v271_v8 }
 0x168   :  { %589 = vmatpush.bf16.msrb.mxu0 %v3665_v6 }
 0x169   :  { %v273_v13 = vadd.f32 0.00028619796, %v272_v10  ;;  %v284_v14 = vadd.f32 0.001143296, %v283_v11  ;;  %v3664_v10 = vld [vmem:[#allocation2 + $0x118] sm:$0xff] }
 0x16b   :  { %v274_v15 = vmul.f32 %v273_v13, %v271_v8  ;;  %v285_v16 = vmul.f32 %v284_v14, %v271_v8 }
 0x16c   :  { %590 = vmatpush.bf16.msrb.mxu0 %v3664_v10 }
 0x16d   :  { %v286_v18 = vadd.f32 0.014752088, %v285_v16  ;;  %v275_v19 = vadd.f32 0.0036580483, %v274_v15  ;;  %v3663_v15 = vld [vmem:[#allocation2 + $0x110] sm:$0xff] }
 0x16f   :  { %v287_v20 = vmul.f32 %v286_v18, %v271_v8  ;;  %v276_v23 = vmul.f32 %v275_v19, %v271_v8  ;;  %v3662_v18 = vld [vmem:[#allocation2 + $0x108] sm:$0xff] }
 0x170   :  { %591 = vmatpush.bf16.msrb.mxu0 %v3663_v15 }
 0x171   :  { %v288_v22 = vadd.f32 0.112945676, %v287_v20  ;;  %v277_v26 = vadd.f32 0.05243302, %v276_v23 }
 0x173   :  { %v289_v24 = vmul.f32 %v288_v22, %v271_v8  ;;  %v278_v31 = vmul.f32 %v277_v26, %v271_v8  ;;  %v3661_v22 = vld [vmem:[#allocation2 + $0x100] sm:$0xff] }
 0x174   :  { %592 = vmatpush.bf16.msrb.mxu0 %v3662_v18 }
 0x175   :  { %v290_v25 = vadd.f32 0.4994258, %v289_v24  ;;  %v279_v33 = vadd.f32 0.18741608, %v278_v31 }
 0x177   :  { %v291_v28 = vmul.f32 %v290_v25, %v271_v8  ;;  %v280_v36 = vmul.f32 %v279_v33, %v271_v8 }
 0x178   :  { %593 = vmatpush.bf16.msrb.mxu0 %v3661_v22 }
 0x179   :  { %v292_v30 = vadd.f32 1.0, %v291_v28  ;;  %v281_v41 = vadd.f32 1.1283791, %v280_v36 }
 0x17b   :  { %3841 = vrcp.f32 %v292_v30  ;;  %v304_v40 = vand.u32 2147483648, %v292_v30  ;;  %v302_v43 = vand.u32 2147483647, %v292_v30  ;;  %vm298_vm5 = vweird.f32 %v292_v30 }
 0x17c   :  { %v282_v47 = vmul.f32 %v281_v41, %v269_v5 }
 0x17d   :  { %v305_v46 = vor.u32 1.1754944e-38, %v304_v40  ;;  %vm303_vm7 = vcmp.eq.f32.partialorder %v302_v43, 8.507059e+37 }
 0x181   :  { %v3842_v35 = vpop.eup %3841 }
 0x182   :  { %v294_v37 = vmul.f32 %v3842_v35, %v292_v30  ;;  %vm299_vm4 = vweird.f32 %v3842_v35 }
 0x183   :  { %vm300_vm6 = vmor %vm298_vm5, %vm299_vm4 }
 0x184   :  { %v295_v38 = vsub.f32 1.0, %v294_v37 }
 0x186   :  { %v296_v42 = vmul.f32 %v3842_v35, %v295_v38 }
 0x188   :  { %v297_v44 = vadd.f32 %v3842_v35, %v296_v42 }
 0x18a   :  { %v301_v48 = vsel %vm300_vm6, %v3842_v35, %v297_v44 }
 0x18b   :  { %v306_v49 = vsel %vm303_vm7, %v305_v46, %v301_v48 }
 0x18c   :  { %v307_v50 = vmul.f32 %v306_v49, %v282_v47 }
 0x18e   :  { %v2877_v52 = vclamps-f32 %v307_v50, 1.0 }
 0x190   :  { %v310_v54 = vadd.f32 1.0, %v2877_v52 }
 0x192   :  { %v311_v55 = vmul.f32 %v310_v54, %v268_v53 }
 0x194   :  { %v312_v56 = vpack.c.bf16 %v311_v55, %v311_v55 }
 0x196   :  { %388 = vmatmul.bf16.vlgmr.msra.gmra.mxu2 %v312_v56 }
 0x219   :  { %v389_v59 = vpop.f32.mrf.mxu2 }
 0x21a   :  { %v390_v60 = vadd.f32 %v3836_v58, %v389_v59 }
 0x21c   :  { %v393_v61 = vpack.c.bf16 %v390_v60, %v390_v60 }
 0x21e   :  { %469 = vmatmul.bf16.vlgmr.msra.gmra.mxu3 %v393_v61 }
 0x221   :  { %v391_v62 = vpop.f32.mrf.mxu2 }
 0x2a1   :  { %v470_v2 = vpop.f32.mrf.mxu3 }
 0x2a2   :  { %v471_v4 = vadd.f32 %v3837_v1, %v470_v2 }
 0x2a4   :  { %v475_v5 = vmul.f32 0.70710677, %v471_v4  ;;  %v474_v47 = vmul.f32 0.5, %v471_v4 }
 0x2a6   :  { %v476_v7 = vmul.f32 %v475_v5, %v475_v5 }
 0x2a8   :  { %v477_v8 = vmin.f32 %v476_v7, 16.0 }
 0x2a9   :  { %v472_v9 = vpop.f32.mrf.mxu3 }
 0x2aa   :  { %v478_v11 = vmul.f32 2.1237322e-06, %v477_v8  ;;  %v489_v12 = vmul.f32 3.8918573e-05, %v477_v8 }
 0x2ac   :  { %v479_v13 = vadd.f32 0.00028619796, %v478_v11  ;;  %v490_v14 = vadd.f32 0.001143296, %v489_v12 }
 0x2ae   :  { %v480_v16 = vmul.f32 %v479_v13, %v477_v8  ;;  %v491_v17 = vmul.f32 %v490_v14, %v477_v8 }
 0x2b0   :  { %v492_v19 = vadd.f32 0.014752088, %v491_v17  ;;  %v481_v20 = vadd.f32 0.0036580483, %v480_v16 }
 0x2b2   :  { %v493_v21 = vmul.f32 %v492_v19, %v477_v8  ;;  %v482_v24 = vmul.f32 %v481_v20, %v477_v8 }
 0x2b4   :  { %v494_v23 = vadd.f32 0.112945676, %v493_v21  ;;  %v483_v27 = vadd.f32 0.05243302, %v482_v24 }
 0x2b6   :  { %v495_v25 = vmul.f32 %v494_v23, %v477_v8  ;;  %v484_v30 = vmul.f32 %v483_v27, %v477_v8 }
 0x2b8   :  { %v496_v26 = vadd.f32 0.4994258, %v495_v25  ;;  %v485_v31 = vadd.f32 0.18741608, %v484_v30 }
 0x2ba   :  { %v497_v28 = vmul.f32 %v496_v26, %v477_v8  ;;  %v486_v33 = vmul.f32 %v485_v31, %v477_v8 }
 0x2bc   :  { %v498_v29 = vadd.f32 1.0, %v497_v28  ;;  %v487_v37 = vadd.f32 1.1283791, %v486_v33 }
 0x2be   :  { %3843 = vrcp.f32 %v498_v29  ;;  %v510_v36 = vand.u32 2147483648, %v498_v29  ;;  %v508_v39 = vand.u32 2147483647, %v498_v29  ;;  %vm504_vm9 = vweird.f32 %v498_v29 }
 0x2bf   :  { %v488_v42 = vmul.f32 %v487_v37, %v475_v5 }
 0x2c0   :  { %v511_v41 = vor.u32 1.1754944e-38, %v510_v36  ;;  %vm509_vm11 = vcmp.eq.f32.partialorder %v508_v39, 8.507059e+37 }
 0x2c4   :  { %v3844_v32 = vpop.eup %3843 }
 0x2c5   :  { %v500_v34 = vmul.f32 %v3844_v32, %v498_v29  ;;  %vm505_vm8 = vweird.f32 %v3844_v32 }
 0x2c6   :  { %vm506_vm10 = vmor %vm504_vm9, %vm505_vm8 }
 0x2c7   :  { %v501_v35 = vsub.f32 1.0, %v500_v34 }
 0x2c9   :  { %v502_v38 = vmul.f32 %v3844_v32, %v501_v35 }
 0x2cb   :  { %v503_v40 = vadd.f32 %v3844_v32, %v502_v38 }
 0x2cd   :  { %v507_v43 = vsel %vm506_vm10, %v3844_v32, %v503_v40 }
 0x2ce   :  { %v512_v44 = vsel %vm509_vm11, %v511_v41, %v507_v43 }
 0x2cf   :  { %v513_v45 = vmul.f32 %v512_v44, %v488_v42 }
 0x2d1   :  { %v2942_v46 = vclamps-f32 %v513_v45, 1.0 }
 0x2d3   :  { %v516_v48 = vadd.f32 1.0, %v2942_v46 }
 0x2d5   :  { %v517_v49 = vmul.f32 %v516_v48, %v474_v47 }
 0x2d7   :  { %v518_v50 = vpack.c.bf16 %v517_v49, %v517_v49 }
 0x2d9   :  { %594 = vmatmul.bf16.vlgmr.msrb.gmra.mxu0 %v518_v50 }
 0x356   :  { %v595_v52 = vpop.f32.mrf.mxu0 }
 0x357   :  { %v596_v53 = vadd.f32 %v3838_v51, %v595_v52 }
 0x359   :  { %v600_v54 = vmul.f32 0.70710677, %v596_v53  ;;  %v599_v27 = vmul.f32 0.5, %v596_v53 }
 0x35b   :  { %v601_v55 = vmul.f32 %v600_v54, %v600_v54 }
 0x35d   :  { %v602_v56 = vmin.f32 %v601_v55, 16.0 }
 0x35e   :  { %v597_v57 = vpop.f32.mrf.mxu0 }
 0x35f   :  { %v603_v58 = vmul.f32 2.1237322e-06, %v602_v56  ;;  %v614_v59 = vmul.f32 3.8918573e-05, %v602_v56 }
 0x361   :  { %v604_v60 = vadd.f32 0.00028619796, %v603_v58  ;;  %v615_v61 = vadd.f32 0.001143296, %v614_v59 }
 0x363   :  { %v605_v62 = vmul.f32 %v604_v60, %v602_v56  ;;  %v616_v63 = vmul.f32 %v615_v61, %v602_v56 }
 0x365   :  { %v617_v0 = vadd.f32 0.014752088, %v616_v63  ;;  %v606_v1 = vadd.f32 0.0036580483, %v605_v62 }
 0x367   :  { %v618_v2 = vmul.f32 %v617_v0, %v602_v56  ;;  %v607_v4 = vmul.f32 %v606_v1, %v602_v56 }
 0x369   :  { %v619_v3 = vadd.f32 0.112945676, %v618_v2  ;;  %v608_v7 = vadd.f32 0.05243302, %v607_v4 }
 0x36b   :  { %v620_v5 = vmul.f32 %v619_v3, %v602_v56  ;;  %v609_v10 = vmul.f32 %v608_v7, %v602_v56 }
 0x36d   :  { %v621_v6 = vadd.f32 0.4994258, %v620_v5  ;;  %v610_v11 = vadd.f32 0.18741608, %v609_v10 }
 0x36f   :  { %v622_v8 = vmul.f32 %v621_v6, %v602_v56  ;;  %v611_v13 = vmul.f32 %v610_v11, %v602_v56 }
 0x371   :  { %v623_v9 = vadd.f32 1.0, %v622_v8  ;;  %v612_v17 = vadd.f32 1.1283791, %v611_v13 }
 0x373   :  { %3845 = vrcp.f32 %v623_v9  ;;  %v635_v16 = vand.u32 2147483648, %v623_v9  ;;  %v633_v19 = vand.u32 2147483647, %v623_v9  ;;  %vm629_vm13 = vweird.f32 %v623_v9 }
 0x374   :  { %v613_v22 = vmul.f32 %v612_v17, %v600_v54 }
 0x375   :  { %v636_v21 = vor.u32 1.1754944e-38, %v635_v16  ;;  %vm634_vm15 = vcmp.eq.f32.partialorder %v633_v19, 8.507059e+37 }
 0x379   :  { %v3846_v12 = vpop.eup %3845 }
 0x37a   :  { %v625_v14 = vmul.f32 %v3846_v12, %v623_v9  ;;  %vm630_vm12 = vweird.f32 %v3846_v12 }
 0x37b   :  { %vm631_vm14 = vmor %vm629_vm13, %vm630_vm12 }
 0x37c   :  { %v626_v15 = vsub.f32 1.0, %v625_v14 }
 0x37e   :  { %v627_v18 = vmul.f32 %v3846_v12, %v626_v15 }
 0x380   :  { %v628_v20 = vadd.f32 %v3846_v12, %v627_v18 }
 0x382   :  { %v632_v23 = vsel %vm631_vm14, %v3846_v12, %v628_v20 }
 0x383   :  { %v637_v24 = vsel %vm634_vm15, %v636_v21, %v632_v23 }
 0x384   :  { %v638_v25 = vmul.f32 %v637_v24, %v613_v22 }
 0x386   :  { %v2975_v26 = vclamps-f32 %v638_v25, 1.0 }
 0x388   :  { %v641_v28 = vadd.f32 1.0, %v2975_v26 }
 0x38a   :  { %v642_v29 = vmul.f32 %v641_v28, %v599_v27 }
 0x38b   :  { %4040 = dma.done.wait [#allocation3 + $0x1], 6144 }
 0x38c   :  { %4041 = vsyncadd [#allocation3 + $0x1], 4294961152  ;;  %s648_s5 = scalar_lea.hbm %s4150_s2, 704  ;;  %v662_v45 = vpack.c.bf16 %v642_v29, %v642_v29  ;;  %v3847_v47 = vld [vmem:[#allocation4 + $0x5] ss:$0 sm:$0xff] }
 0x38d   :  { %s656_s6 = sshll.u32 %s648_s5, 4  ;;  %v3848_v54 = vld [vmem:[#allocation4 + $0x6] ss:$0 sm:$0xff]  ;;  %s657_s6 = int_to_ptr.hbm [resolvable:$true] %s656_s6 }
 0x38e   :  { %661 = dma.hbm_to_vmem [thread:$0]  %s657_s6, 6144, %s4079_s23, [#allocation3] }
 0x38f   :  { %v3676_v30 = vld [vmem:[#allocation2 + $0x1b8] sm:$0xff]  ;;  %v3675_v31 = vld [vmem:[#allocation2 + $0x1b0] sm:$0xff]  ;;  %v3674_v34 = vld [vmem:[#allocation2 + $0x1a8] sm:$0xff] }
 0x390   :  { %729 = vmatpush.bf16.msrb.mxu1 %v3676_v30  ;;  %v3684_v32 = vld [vmem:[#allocation2 + $0x1f8] sm:$0xff]  ;;  %v3683_v33 = vld [vmem:[#allocation2 + $0x1f0] sm:$0xff]  ;;  %v3682_v35 = vld [vmem:[#allocation2 + $0x1e8] sm:$0xff] }
 0x391   :  { %810 = vmatpush.bf16.msrb.mxu2 %v3684_v32  ;;  %v3673_v36 = vld [vmem:[#allocation2 + $0x1a0] sm:$0xff]  ;;  %v3672_v38 = vld [vmem:[#allocation2 + $0x198] sm:$0xff]  ;;  %v3671_v40 = vld [vmem:[#allocation2 + $0x190] sm:$0xff] }
 0x392   :  { %v3681_v37 = vld [vmem:[#allocation2 + $0x1e0] sm:$0xff]  ;;  %v3680_v39 = vld [vmem:[#allocation2 + $0x1d8] sm:$0xff]  ;;  %v3679_v41 = vld [vmem:[#allocation2 + $0x1d0] sm:$0xff] }
 0x393   :  { %v3670_v42 = vld [vmem:[#allocation2 + $0x188] sm:$0xff]  ;;  %v3669_v44 = vld [vmem:[#allocation2 + $0x180] sm:$0xff]  ;;  %v3692_v52 = vld [vmem:[#allocation2 + $0x238] sm:$0xff] }
 0x394   :  { %730 = vmatpush.bf16.msrb.mxu1 %v3675_v31  ;;  %v3678_v43 = vld [vmem:[#allocation2 + $0x1c8] sm:$0xff]  ;;  %v3677_v46 = vld [vmem:[#allocation2 + $0x1c0] sm:$0xff]  ;;  %935 = vmatpush.bf16.msrb.mxu3 %v3692_v52  ;;  %v3691_v53 = vld [vmem:[#allocation2 + $0x230] sm:$0xff] }
 0x395   :  { %811 = vmatpush.bf16.msrb.mxu2 %v3683_v33  ;;  %v3690_v55 = vld [vmem:[#allocation2 + $0x228] sm:$0xff]  ;;  %v3689_v58 = vld [vmem:[#allocation2 + $0x220] sm:$0xff]  ;;  %v3688_v61 = vld [vmem:[#allocation2 + $0x218] sm:$0xff] }
 0x396   :  { %v3687_v1 = vld [vmem:[#allocation2 + $0x210] sm:$0xff]  ;;  %v3686_v6 = vld [vmem:[#allocation2 + $0x208] sm:$0xff]  ;;  %v3685_v10 = vld [vmem:[#allocation2 + $0x200] sm:$0xff] }
 0x398   :  { %731 = vmatpush.bf16.msrb.mxu1 %v3674_v34  ;;  %936 = vmatpush.bf16.msrb.mxu3 %v3691_v53 }
 0x399   :  { %812 = vmatpush.bf16.msrb.mxu2 %v3682_v35 }
 0x39c   :  { %732 = vmatpush.bf16.msrb.mxu1 %v3673_v36  ;;  %937 = vmatpush.bf16.msrb.mxu3 %v3690_v55 }
 0x39d   :  { %813 = vmatpush.bf16.msrb.mxu2 %v3681_v37 }
 0x3a0   :  { %733 = vmatpush.bf16.msrb.mxu1 %v3672_v38  ;;  %938 = vmatpush.bf16.msrb.mxu3 %v3689_v58 }
 0x3a1   :  { %814 = vmatpush.bf16.msrb.mxu2 %v3680_v39 }
 0x3a4   :  { %734 = vmatpush.bf16.msrb.mxu1 %v3671_v40  ;;  %939 = vmatpush.bf16.msrb.mxu3 %v3688_v61  ;;  %v3700_v40 = vld [vmem:[#allocation2 + $0x278] sm:$0xff] }
 0x3a5   :  { %815 = vmatpush.bf16.msrb.mxu2 %v3679_v41  ;;  %1060 = vmatpush.bf16.msra.mxu0 %v3700_v40  ;;  %v3699_v41 = vld [vmem:[#allocation2 + $0x270] sm:$0xff] }
 0x3a8   :  { %735 = vmatpush.bf16.msrb.mxu1 %v3670_v42  ;;  %940 = vmatpush.bf16.msrb.mxu3 %v3687_v1  ;;  %v3849_v42 = vld [vmem:[#allocation4 + $0x7] ss:$0 sm:$0xff] }
 0x3a9   :  { %816 = vmatpush.bf16.msrb.mxu2 %v3678_v43  ;;  %1061 = vmatpush.bf16.msra.mxu0 %v3699_v41  ;;  %v3698_v43 = vld [vmem:[#allocation2 + $0x268] sm:$0xff] }
 0x3ac   :  { %736 = vmatpush.bf16.msrb.mxu1 %v3669_v44  ;;  %941 = vmatpush.bf16.msrb.mxu3 %v3686_v6  ;;  %v3716_v6 = vld [vmem:[#allocation2 + $0x2f8] sm:$0xff] }
 0x3ad   :  { %817 = vmatpush.bf16.msrb.mxu2 %v3677_v46  ;;  %1062 = vmatpush.bf16.msra.mxu0 %v3698_v43  ;;  %v3697_v46 = vld [vmem:[#allocation2 + $0x260] sm:$0xff] }
 0x3ae   :  { %v3709_v43 = vld [vmem:[#allocation2 + $0x2c0] sm:$0xff] }
 0x3af   :  { %737 = vmatmul.bf16.vlgmr.msrb.gmra.mxu1 %v662_v45 }
 0x3b0   :  { %942 = vmatpush.bf16.msrb.mxu3 %v3685_v10 }
 0x3b1   :  { %1063 = vmatpush.bf16.msra.mxu0 %v3697_v46  ;;  %1265 = vmatpush.bf16.msra.mxu2 %v3716_v6 }
 0x42c   :  { %v738_v48 = vpop.f32.mrf.mxu1 }
 0x42d   :  { %v739_v49 = vadd.f32 %v3847_v47, %v738_v48 }
 0x42f   :  { %v742_v50 = vpack.c.bf16 %v739_v49, %v739_v49  ;;  %v3696_v49 = vld [vmem:[#allocation2 + $0x258] sm:$0xff] }
 0x430   :  { %1064 = vmatpush.bf16.msra.mxu0 %v3696_v49 }
 0x431   :  { %818 = vmatmul.bf16.vlgmr.msrb.gmra.mxu2 %v742_v50 }
 0x434   :  { %v740_v51 = vpop.f32.mrf.mxu1 }
 0x4b4   :  { %v819_v56 = vpop.f32.mrf.mxu2 }
 0x4b5   :  { %v820_v57 = vadd.f32 %v3848_v54, %v819_v56  ;;  %v3695_v54 = vld [vmem:[#allocation2 + $0x250] sm:$0xff] }
 0x4b6   :  { %1065 = vmatpush.bf16.msra.mxu0 %v3695_v54 }
 0x4b7   :  { %v824_v59 = vmul.f32 0.70710677, %v820_v57  ;;  %v823_v36 = vmul.f32 0.5, %v820_v57 }
 0x4b9   :  { %v825_v60 = vmul.f32 %v824_v59, %v824_v59 }
 0x4bb   :  { %v826_v62 = vmin.f32 %v825_v60, 16.0 }
 0x4bc   :  { %v821_v63 = vpop.f32.mrf.mxu2 }
 0x4bd   :  { %v827_v0 = vmul.f32 2.1237322e-06, %v826_v62  ;;  %v838_v2 = vmul.f32 3.8918573e-05, %v826_v62  ;;  %v3693_v63 = vld [vmem:[#allocation2 + $0x240] sm:$0xff] }
 0x4bf   :  { %v828_v3 = vadd.f32 0.00028619796, %v827_v0  ;;  %v839_v4 = vadd.f32 0.001143296, %v838_v2 }
 0x4c1   :  { %v829_v5 = vmul.f32 %v828_v3, %v826_v62  ;;  %v840_v7 = vmul.f32 %v839_v4, %v826_v62 }
 0x4c3   :  { %v841_v8 = vadd.f32 0.014752088, %v840_v7  ;;  %v830_v9 = vadd.f32 0.0036580483, %v829_v5  ;;  %v3708_v5 = vld [vmem:[#allocation2 + $0x2b8] sm:$0xff] }
 0x4c4   :  { %1141 = vmatpush.bf16.msra.mxu1 %v3708_v5 }
 0x4c5   :  { %v842_v11 = vmul.f32 %v841_v8, %v826_v62  ;;  %v831_v13 = vmul.f32 %v830_v9, %v826_v62  ;;  %v3707_v8 = vld [vmem:[#allocation2 + $0x2b0] sm:$0xff] }
 0x4c6   :  { %v3715_v9 = vld [vmem:[#allocation2 + $0x2f0] sm:$0xff] }
 0x4c7   :  { %v843_v12 = vadd.f32 0.112945676, %v842_v11  ;;  %v832_v16 = vadd.f32 0.05243302, %v831_v13  ;;  %1266 = vmatpush.bf16.msra.mxu2 %v3715_v9  ;;  %v3714_v13 = vld [vmem:[#allocation2 + $0x2e8] sm:$0xff] }
 0x4c8   :  { %1142 = vmatpush.bf16.msra.mxu1 %v3707_v8 }
 0x4c9   :  { %v844_v14 = vmul.f32 %v843_v12, %v826_v62  ;;  %v833_v19 = vmul.f32 %v832_v16, %v826_v62  ;;  %v3706_v12 = vld [vmem:[#allocation2 + $0x2a8] sm:$0xff]  ;;  %v3713_v16 = vld [vmem:[#allocation2 + $0x2e0] sm:$0xff] }
 0x4cb   :  { %v845_v15 = vadd.f32 0.4994258, %v844_v14  ;;  %v834_v20 = vadd.f32 0.18741608, %v833_v19  ;;  %1267 = vmatpush.bf16.msra.mxu2 %v3714_v13 }
 0x4cc   :  { %1143 = vmatpush.bf16.msra.mxu1 %v3706_v12 }
 0x4cd   :  { %v846_v17 = vmul.f32 %v845_v15, %v826_v62  ;;  %v835_v22 = vmul.f32 %v834_v20, %v826_v62  ;;  %v3705_v15 = vld [vmem:[#allocation2 + $0x2a0] sm:$0xff] }
 0x4cf   :  { %v847_v18 = vadd.f32 1.0, %v846_v17  ;;  %v836_v26 = vadd.f32 1.1283791, %v835_v22  ;;  %1268 = vmatpush.bf16.msra.mxu2 %v3713_v16  ;;  %v3712_v22 = vld [vmem:[#allocation2 + $0x2d8] sm:$0xff] }
 0x4d0   :  { %1144 = vmatpush.bf16.msra.mxu1 %v3705_v15 }
 0x4d1   :  { %3853 = vrcp.f32 %v847_v18  ;;  %v859_v25 = vand.u32 2147483648, %v847_v18  ;;  %v857_v28 = vand.u32 2147483647, %v847_v18  ;;  %vm853_vm1 = vweird.f32 %v847_v18 }
 0x4d2   :  { %v837_v31 = vmul.f32 %v836_v26, %v824_v59  ;;  %v3694_v59 = vld [vmem:[#allocation2 + $0x248] sm:$0xff] }
 0x4d3   :  { %v860_v30 = vor.u32 1.1754944e-38, %v859_v25  ;;  %vm858_vm3 = vcmp.eq.f32.partialorder %v857_v28, 8.507059e+37  ;;  %1066 = vmatpush.bf16.msra.mxu0 %v3694_v59  ;;  %1269 = vmatpush.bf16.msra.mxu2 %v3712_v22  ;;  %v3703_v28 = vld [vmem:[#allocation2 + $0x290] sm:$0xff] }
 0x4d7   :  { %v3854_v21 = vpop.eup %3853  ;;  %1067 = vmatpush.bf16.msra.mxu0 %v3693_v63 }
 0x4d8   :  { %v849_v23 = vmul.f32 %v3854_v21, %v847_v18  ;;  %vm854_vm0 = vweird.f32 %v3854_v21 }
 0x4d9   :  { %vm855_vm2 = vmor %vm853_vm1, %vm854_vm0 }
 0x4da   :  { %v850_v24 = vsub.f32 1.0, %v849_v23 }
 0x4dc   :  { %v851_v27 = vmul.f32 %v3854_v21, %v850_v24 }
 0x4de   :  { %v852_v29 = vadd.f32 %v3854_v21, %v851_v27 }
 0x4e0   :  { %v856_v32 = vsel %vm855_vm2, %v3854_v21, %v852_v29  ;;  %v3704_v21 = vld [vmem:[#allocation2 + $0x298] sm:$0xff]  ;;  %v3711_v29 = vld [vmem:[#allocation2 + $0x2d0] sm:$0xff] }
 0x4e1   :  { %v861_v33 = vsel %vm858_vm3, %v860_v30, %v856_v32  ;;  %1145 = vmatpush.bf16.msra.mxu1 %v3704_v21  ;;  %1270 = vmatpush.bf16.msra.mxu2 %v3711_v29 }
 0x4e2   :  { %v862_v34 = vmul.f32 %v861_v33, %v837_v31 }
 0x4e4   :  { %v3040_v35 = vclamps-f32 %v862_v34, 1.0 }
 0x4e5   :  { %1146 = vmatpush.bf16.msra.mxu1 %v3703_v28 }
 0x4e6   :  { %v865_v37 = vadd.f32 1.0, %v3040_v35  ;;  %v3702_v35 = vld [vmem:[#allocation2 + $0x288] sm:$0xff] }
 0x4e8   :  { %v866_v38 = vmul.f32 %v865_v37, %v823_v36  ;;  %v3710_v36 = vld [vmem:[#allocation2 + $0x2c8] sm:$0xff] }
 0x4e9   :  { %1147 = vmatpush.bf16.msra.mxu1 %v3702_v35  ;;  %1271 = vmatpush.bf16.msra.mxu2 %v3710_v36 }
 0x4ea   :  { %v867_v39 = vpack.c.bf16 %v866_v38, %v866_v38 }
 0x4ec   :  { %943 = vmatmul.bf16.vlgmr.msrb.gmra.mxu3 %v867_v39 }
 0x4ed   :  { %1272 = vmatpush.bf16.msra.mxu2 %v3709_v43 }
 0x56f   :  { %v944_v44 = vpop.f32.mrf.mxu3 }
 0x570   :  { %v4101_v45 = vadd.f32 %v3849_v42, %v944_v44  ;;  %v3701_v42 = vld [vmem:[#allocation2 + $0x280] sm:$0xff]  ;;  %v3850_v44 = vld [vmem:[#allocation4 + $0x8] ss:$0 sm:$0xff] }
 0x571   :  { %1148 = vmatpush.bf16.msra.mxu1 %v3701_v42 }
 0x572   :  { %v4104_v47 = vmul.f32 0.70710677, %v4101_v45  ;;  %v948_v38 = vmul.f32 0.5, %v4101_v45 }
 0x574   :  { %v950_v48 = vmul.f32 %v4104_v47, %v4104_v47 }
 0x576   :  { %v951_v50 = vmin.f32 %v950_v48, 16.0 }
 0x577   :  { %v946_v51 = vpop.f32.mrf.mxu3 }
 0x578   :  { %v952_v52 = vmul.f32 2.1237322e-06, %v951_v50  ;;  %v963_v53 = vmul.f32 3.8918573e-05, %v951_v50 }
 0x57a   :  { %v953_v55 = vadd.f32 0.00028619796, %v952_v52  ;;  %v964_v56 = vadd.f32 0.001143296, %v963_v53  ;;  %v3852_v53 = vld [vmem:[#allocation4 + $0xa] ss:$0 sm:$0xff] }
 0x57c   :  { %v954_v57 = vmul.f32 %v953_v55, %v951_v50  ;;  %v965_v58 = vmul.f32 %v964_v56, %v951_v50 }
 0x57e   :  { %v966_v60 = vadd.f32 0.014752088, %v965_v58  ;;  %v955_v61 = vadd.f32 0.0036580483, %v954_v57 }
 0x580   :  { %v967_v62 = vmul.f32 %v966_v60, %v951_v50  ;;  %v956_v1 = vmul.f32 %v955_v61, %v951_v50 }
 0x582   :  { %v968_v0 = vadd.f32 0.112945676, %v967_v62  ;;  %v957_v4 = vadd.f32 0.05243302, %v956_v1 }
 0x584   :  { %v969_v2 = vmul.f32 %v968_v0, %v951_v50  ;;  %v958_v11 = vmul.f32 %v957_v4, %v951_v50 }
 0x586   :  { %v970_v3 = vadd.f32 0.4994258, %v969_v2  ;;  %v959_v14 = vadd.f32 0.18741608, %v958_v11 }
 0x588   :  { %v971_v7 = vmul.f32 %v970_v3, %v951_v50  ;;  %v960_v18 = vmul.f32 %v959_v14, %v951_v50  ;;  %v3851_v50 = vld [vmem:[#allocation4 + $0x9] ss:$0 sm:$0xff] }
 0x58a   :  { %v972_v10 = vadd.f32 1.0, %v971_v7  ;;  %v961_v24 = vadd.f32 1.1283791, %v960_v18 }
 0x58c   :  { %3855 = vrcp.f32 %v972_v10  ;;  %v984_v23 = vand.u32 2147483648, %v972_v10  ;;  %v982_v26 = vand.u32 2147483647, %v972_v10  ;;  %vm978_vm5 = vweird.f32 %v972_v10 }
 0x58d   :  { %v962_v31 = vmul.f32 %v961_v24, %v4104_v47 }
 0x58e   :  { %v985_v30 = vor.u32 1.1754944e-38, %v984_v23  ;;  %vm983_vm7 = vcmp.eq.f32.partialorder %v982_v26, 8.507059e+37 }
 0x592   :  { %v3856_v17 = vpop.eup %3855 }
 0x593   :  { %v974_v19 = vmul.f32 %v3856_v17, %v972_v10  ;;  %vm979_vm4 = vweird.f32 %v3856_v17 }
 0x594   :  { %vm980_vm6 = vmor %vm978_vm5, %vm979_vm4 }
 0x595   :  { %v975_v20 = vsub.f32 1.0, %v974_v19 }
 0x597   :  { %v976_v25 = vmul.f32 %v3856_v17, %v975_v20 }
 0x599   :  { %v977_v27 = vadd.f32 %v3856_v17, %v976_v25 }
 0x59b   :  { %v981_v32 = vsel %vm980_vm6, %v3856_v17, %v977_v27 }
 0x59c   :  { %v986_v33 = vsel %vm983_vm7, %v985_v30, %v981_v32 }
 0x59d   :  { %v987_v34 = vmul.f32 %v986_v33, %v962_v31 }
 0x59f   :  { %v3073_v37 = vclamps-f32 %v987_v34, 1.0 }
 0x5a1   :  { %v990_v39 = vadd.f32 1.0, %v3073_v37 }
 0x5a3   :  { %v991_v40 = vmul.f32 %v990_v39, %v948_v38 }
 0x5a5   :  { %v992_v41 = vpack.c.bf16 %v991_v40, %v991_v40 }
 0x5a7   :  { %1068 = vmatmul.bf16.vlgmr.msra.gmra.mxu0 %v992_v41 }
 0x624   :  { %v1069_v46 = vpop.f32.mrf.mxu0 }
 0x625   :  { %v1070_v47 = vadd.f32 %v3850_v44, %v1069_v46 }
 0x627   :  { %v1073_v48 = vpack.c.bf16 %v1070_v47, %v1070_v47 }
 0x629   :  { %1149 = vmatmul.bf16.vlgmr.msra.gmra.mxu1 %v1073_v48  ;;  %1273 = vmatmul.bf16.vlgmr.msra.gmra.mxu2 %v1073_v48 }
 0x62c   :  { %v1071_v49 = vpop.f32.mrf.mxu0 }
 0x6a6   :  { %v1150_v51 = vpop.f32.mrf.mxu1 }
 0x6a7   :  { %v4110_v45 = vadd.f32 %v3851_v50, %v1150_v51 }
 0x6a9   :  { %v4113_v52 = vmul.f32 0.70710677, %v4110_v45 }
 0x6ab   :  { %v1156_v54 = vmul.f32 %v4113_v52, %v4113_v52 }
 0x6ac   :  { %v1274_v55 = vpop.f32.mrf.mxu2 }
 0x6ad   :  { %v1157_v56 = vmin.f32 %v1156_v54, 16.0  ;;  %v4117_v57 = vadd.f32 %v3852_v53, %v1274_v55 }
 0x6ae   :  { %v1152_v58 = vpop.f32.mrf.mxu1 }
 0x6af   :  { %v1158_v59 = vmul.f32 2.1237322e-06, %v1157_v56  ;;  %v1169_v60 = vmul.f32 3.8918573e-05, %v1157_v56  ;;  %v4120_v61 = vmul.f32 0.70710677, %v4117_v57 }
 0x6b1   :  { %v1159_v62 = vadd.f32 0.00028619796, %v1158_v59  ;;  %v1170_v63 = vadd.f32 0.001143296, %v1169_v60  ;;  %v1280_v0 = vmul.f32 %v4120_v61, %v4120_v61 }
 0x6b3   :  { %v1160_v1 = vmul.f32 %v1159_v62, %v1157_v56  ;;  %v1171_v2 = vmul.f32 %v1170_v63, %v1157_v56  ;;  %v1281_v3 = vmin.f32 %v1280_v0, 16.0  ;;  %v1154_v63 = vmul.f32 0.5, %v4110_v45 }
 0x6b4   :  { %v1276_v4 = vpop.f32.mrf.mxu2 }
 0x6b5   :  { %v1172_v5 = vadd.f32 0.014752088, %v1171_v2  ;;  %v1161_v6 = vadd.f32 0.0036580483, %v1160_v1  ;;  %v1282_v7 = vmul.f32 2.1237322e-06, %v1281_v3 }
 0x6b6   :  { %v1293_v8 = vmul.f32 3.8918573e-05, %v1281_v3 }
 0x6b7   :  { %v1173_v9 = vmul.f32 %v1172_v5, %v1157_v56  ;;  %v1283_v10 = vadd.f32 0.00028619796, %v1282_v7  ;;  %v1162_v13 = vmul.f32 %v1161_v6, %v1157_v56  ;;  %v1278_v7 = vmul.f32 0.5, %v4117_v57 }
 0x6b8   :  { %v1294_v11 = vadd.f32 0.001143296, %v1293_v8 }
 0x6b9   :  { %v1174_v12 = vadd.f32 0.112945676, %v1173_v9  ;;  %v1284_v14 = vmul.f32 %v1283_v10, %v1281_v3  ;;  %v1163_v20 = vadd.f32 0.05243302, %v1162_v13 }
 0x6ba   :  { %v1295_v15 = vmul.f32 %v1294_v11, %v1281_v3 }
 0x6bb   :  { %v1175_v16 = vmul.f32 %v1174_v12, %v1157_v56  ;;  %v1285_v19 = vadd.f32 0.0036580483, %v1284_v14  ;;  %v1164_v26 = vmul.f32 %v1163_v20, %v1157_v56 }
 0x6bc   :  { %v1296_v17 = vadd.f32 0.014752088, %v1295_v15 }
 0x6bd   :  { %v1176_v18 = vadd.f32 0.4994258, %v1175_v16  ;;  %v1286_v25 = vmul.f32 %v1285_v19, %v1281_v3  ;;  %v1165_v30 = vadd.f32 0.18741608, %v1164_v26 }
 0x6be   :  { %v1297_v21 = vmul.f32 %v1296_v17, %v1281_v3 }
 0x6bf   :  { %v1177_v22 = vmul.f32 %v1176_v18, %v1157_v56  ;;  %v1287_v29 = vadd.f32 0.05243302, %v1286_v25  ;;  %v1166_v35 = vmul.f32 %v1165_v30, %v1157_v56 }
 0x6c0   :  { %v1298_v23 = vadd.f32 0.112945676, %v1297_v21 }
 0x6c1   :  { %v1178_v24 = vadd.f32 1.0, %v1177_v22  ;;  %v1288_v34 = vmul.f32 %v1287_v29, %v1281_v3  ;;  %v1167_v40 = vadd.f32 1.1283791, %v1166_v35 }
 0x6c2   :  { %v1299_v27 = vmul.f32 %v1298_v23, %v1281_v3 }
 0x6c3   :  { %3857 = vrcp.f32 %v1178_v24  ;;  %v1190_v38 = vand.u32 2147483648, %v1178_v24  ;;  %v1289_v39 = vadd.f32 0.18741608, %v1288_v34  ;;  %v1188_v42 = vand.u32 2147483647, %v1178_v24 }
 0x6c4   :  { %v1300_v28 = vadd.f32 0.4994258, %v1299_v27  ;;  %vm1184_vm9 = vweird.f32 %v1178_v24  ;;  %v1168_v49 = vmul.f32 %v1167_v40, %v4113_v52 }
 0x6c5   :  { %v1191_v46 = vor.u32 1.1754944e-38, %v1190_v38  ;;  %v1290_v47 = vmul.f32 %v1289_v39, %v1281_v3  ;;  %vm1189_vm11 = vcmp.eq.f32.partialorder %v1188_v42, 8.507059e+37 }
 0x6c6   :  { %v1301_v31 = vmul.f32 %v1300_v28, %v1281_v3 }
 0x6c7   :  { %v1291_v56 = vadd.f32 1.1283791, %v1290_v47 }
 0x6c8   :  { %v1302_v32 = vadd.f32 1.0, %v1301_v31 }
 0x6c9   :  { %v3858_v33 = vpop.eup %3857  ;;  %v1292_v52 = vmul.f32 %v1291_v56, %v4120_v61 }
 0x6ca   :  { %v1180_v36 = vmul.f32 %v3858_v33, %v1178_v24  ;;  %3859 = vrcp.f32 %v1302_v32  ;;  %vm1185_vm8 = vweird.f32 %v3858_v33  ;;  %v1314_v55 = vand.u32 2147483648, %v1302_v32 }
 0x6cb   :  { %vm1186_vm10 = vmor %vm1184_vm9, %vm1185_vm8  ;;  %v1312_v59 = vand.u32 2147483647, %v1302_v32  ;;  %vm1308_vm13 = vweird.f32 %v1302_v32 }
 0x6cc   :  { %v1181_v37 = vsub.f32 1.0, %v1180_v36  ;;  %v1315_v1 = vor.u32 1.1754944e-38, %v1314_v55 }
 0x6cd   :  { %vm1313_vm15 = vcmp.eq.f32.partialorder %v1312_v59, 8.507059e+37 }
 0x6ce   :  { %v1182_v41 = vmul.f32 %v3858_v33, %v1181_v37 }
 0x6d0   :  { %v3860_v43 = vpop.eup %3859  ;;  %v1183_v44 = vadd.f32 %v3858_v33, %v1182_v41 }
 0x6d1   :  { %v1304_v48 = vmul.f32 %v3860_v43, %v1302_v32  ;;  %vm1309_vm12 = vweird.f32 %v3860_v43 }
 0x6d2   :  { %v1187_v50 = vsel %vm1186_vm10, %v3858_v33, %v1183_v44  ;;  %vm1310_vm14 = vmor %vm1308_vm13, %vm1309_vm12 }
 0x6d3   :  { %v1192_v51 = vsel %vm1189_vm11, %v1191_v46, %v1187_v50  ;;  %v1305_v53 = vsub.f32 1.0, %v1304_v48 }
 0x6d4   :  { %v1193_v54 = vmul.f32 %v1192_v51, %v1168_v49 }
 0x6d5   :  { %v1306_v58 = vmul.f32 %v3860_v43, %v1305_v53 }
 0x6d6   :  { %v3138_v60 = vclamps-f32 %v1193_v54, 1.0 }
 0x6d7   :  { %v1307_v62 = vadd.f32 %v3860_v43, %v1306_v58 }
 0x6d8   :  { %v1196_v0 = vadd.f32 1.0, %v3138_v60 }
 0x6d9   :  { %v1311_v2 = vsel %vm1310_vm14, %v3860_v43, %v1307_v62 }
 0x6da   :  { %v1197_v3 = vmul.f32 %v1196_v0, %v1154_v63  ;;  %v1316_v4 = vsel %vm1313_vm15, %v1315_v1, %v1311_v2 }
 0x6db   :  { %v1317_v5 = vmul.f32 %v1316_v4, %v1292_v52 }
 0x6dd   :  { %v3171_v6 = vclamps-f32 %v1317_v5, 1.0 }
 0x6df   :  { %v1320_v8 = vadd.f32 1.0, %v3171_v6 }
 0x6e1   :  { %v1321_v9 = vmul.f32 %v1320_v8, %v1278_v7 }
 0x6e2   :  { %4042 = dma.done.wait [#allocation3], 6144 }
 0x6e3   :  { %4043 = vsyncadd [#allocation3], 4294961152  ;;  %s1324_s9 = scalar_lea.hbm %s4150_s2, 1088  ;;  %v1355_v23 = vpack.c.bf16 %v1321_v9, %v1321_v9  ;;  %v1338_v24 = vpack.c.bf16 %v1197_v3, %v1197_v3  ;;  %v3861_v28 = vld [vmem:[#allocation4 + $0xb] ss:$0 sm:$0xff] }
 0x6e4   :  { %s1332_s10 = sshll.u32 %s1324_s9, 4  ;;  %s1333_s10 = int_to_ptr.hbm [resolvable:$true] %s1332_s10 }
 0x6e5   :  { %1337 = dma.hbm_to_vmem [thread:$0]  %s1333_s10, 5120, %s60_s30, [#allocation3 + $0x1] }
 0x6e6   :  { %v3732_v45 = vld [vmem:[#allocation2 + $0x78] sm:$0xff]  ;;  %v3731_v10 = vld [vmem:[#allocation2 + $0x70] sm:$0xff]  ;;  %v3730_v57 = vld [vmem:[#allocation2 + $0x68] sm:$0xff] }
 0x6e7   :  { %v3724_v61 = vld [vmem:[#allocation2 + $0x38] sm:$0xff]  ;;  %1420 = vmatpush.bf16.msra.mxu3 %v3732_v45  ;;  %v3723_v11 = vld [vmem:[#allocation2 + $0x30] sm:$0xff]  ;;  %v3722_v12 = vld [vmem:[#allocation2 + $0x28] sm:$0xff] }
 0x6e8   :  { %1481 = vmatpush.bf16.msrb.mxu0 %v3724_v61  ;;  %v3729_v13 = vld [vmem:[#allocation2 + $0x60] sm:$0xff]  ;;  %v3728_v15 = vld [vmem:[#allocation2 + $0x58] sm:$0xff]  ;;  %v3727_v17 = vld [vmem:[#allocation2 + $0x50] sm:$0xff] }
 0x6e9   :  { %v3721_v14 = vld [vmem:[#allocation2 + $0x20] sm:$0xff]  ;;  %v3720_v16 = vld [vmem:[#allocation2 + $0x18] sm:$0xff]  ;;  %v3719_v18 = vld [vmem:[#allocation2 + $0x10] sm:$0xff] }
 0x6ea   :  { %v3726_v19 = vld [vmem:[#allocation2 + $0x48] sm:$0xff]  ;;  %v3725_v21 = vld [vmem:[#allocation2 + $0x40] sm:$0xff]  ;;  %v3740_v25 = vld [vmem:[#allocation2 + $0xb8] sm:$0xff] }
 0x6eb   :  { %1421 = vmatpush.bf16.msra.mxu3 %v3731_v10  ;;  %v3718_v20 = vld [vmem:[#allocation2 + $0x8] sm:$0xff]  ;;  %v3717_v22 = vld [vmem:[#allocation2] sm:$0xff]  ;;  %1608 = vmatpush.bf16.msrb.mxu1 %v3740_v25  ;;  %v3739_v27 = vld [vmem:[#allocation2 + $0xb0] sm:$0xff] }
 0x6ec   :  { %1482 = vmatpush.bf16.msrb.mxu0 %v3723_v11  ;;  %v3738_v29 = vld [vmem:[#allocation2 + $0xa8] sm:$0xff]  ;;  %v3737_v34 = vld [vmem:[#allocation2 + $0xa0] sm:$0xff]  ;;  %v3736_v37 = vld [vmem:[#allocation2 + $0x98] sm:$0xff] }
 0x6ed   :  { %v3735_v41 = vld [vmem:[#allocation2 + $0x90] sm:$0xff]  ;;  %v3734_v47 = vld [vmem:[#allocation2 + $0x88] sm:$0xff]  ;;  %v3733_v51 = vld [vmem:[#allocation2 + $0x80] sm:$0xff] }
 0x6ee   :  { %v3748_v60 = vld [vmem:[#allocation2 + $0xf8] sm:$0xff]  ;;  %v3747_v63 = vld [vmem:[#allocation2 + $0xf0] sm:$0xff]  ;;  %v3746_v52 = vld [vmem:[#allocation2 + $0xe8] sm:$0xff] }
 0x6ef   :  { %1422 = vmatpush.bf16.msra.mxu3 %v3730_v57  ;;  %1609 = vmatpush.bf16.msrb.mxu1 %v3739_v27  ;;  %v3745_v3 = vld [vmem:[#allocation2 + $0xe0] sm:$0xff]  ;;  %v3744_v8 = vld [vmem:[#allocation2 + $0xd8] sm:$0xff]  ;;  %v3743_v57 = vld [vmem:[#allocation2 + $0xd0] sm:$0xff] }
 0x6f0   :  { %1483 = vmatpush.bf16.msrb.mxu0 %v3722_v12  ;;  %1688 = vmatpush.bf16.msrb.mxu2 %v3748_v60 }
 0x6f3   :  { %1423 = vmatpush.bf16.msra.mxu3 %v3729_v13  ;;  %1610 = vmatpush.bf16.msrb.mxu1 %v3738_v29  ;;  %v3756_v29 = vld [vmem:[#allocation2 + $0x138] sm:$0xff] }
 0x6f4   :  { %1484 = vmatpush.bf16.msrb.mxu0 %v3721_v14  ;;  %1689 = vmatpush.bf16.msrb.mxu2 %v3747_v63 }
 0x6f7   :  { %1424 = vmatpush.bf16.msra.mxu3 %v3728_v15  ;;  %1611 = vmatpush.bf16.msrb.mxu1 %v3737_v34 }
 0x6f8   :  { %1485 = vmatpush.bf16.msrb.mxu0 %v3720_v16  ;;  %1690 = vmatpush.bf16.msrb.mxu2 %v3746_v52 }
 0x6fb   :  { %1425 = vmatpush.bf16.msra.mxu3 %v3727_v17  ;;  %1612 = vmatpush.bf16.msrb.mxu1 %v3736_v37  ;;  %v3742_v17 = vld [vmem:[#allocation2 + $0xc8] sm:$0xff] }
 0x6fc   :  { %1486 = vmatpush.bf16.msrb.mxu0 %v3719_v18  ;;  %1691 = vmatpush.bf16.msrb.mxu2 %v3745_v3 }
 0x6ff   :  { %1426 = vmatpush.bf16.msra.mxu3 %v3726_v19  ;;  %1613 = vmatpush.bf16.msrb.mxu1 %v3735_v41 }
 0x700   :  { %1487 = vmatpush.bf16.msrb.mxu0 %v3718_v20  ;;  %1692 = vmatpush.bf16.msrb.mxu2 %v3744_v8 }
 0x703   :  { %1427 = vmatpush.bf16.msra.mxu3 %v3725_v21  ;;  %1614 = vmatpush.bf16.msrb.mxu1 %v3734_v47 }
 0x704   :  { %1488 = vmatpush.bf16.msrb.mxu0 %v3717_v22  ;;  %1693 = vmatpush.bf16.msrb.mxu2 %v3743_v57 }
 0x706   :  { %1428 = vmatmul.bf16.vlgmr.msra.gmra.mxu3 %v1355_v23  ;;  %v3741_v23 = vld [vmem:[#allocation2 + $0xc0] sm:$0xff] }
 0x707   :  { %1489 = vmatmul.bf16.vlgmr.msrb.gmra.mxu0 %v1338_v24  ;;  %1615 = vmatpush.bf16.msrb.mxu1 %v3733_v51  ;;  %v3862_v24 = vld [vmem:[#allocation4 + $0xd] ss:$0 sm:$0xff] }
 0x708   :  { %1694 = vmatpush.bf16.msrb.mxu2 %v3742_v17  ;;  %1812 = vmatpush.bf16.msrb.mxu3 %v3756_v29  ;;  %v3764_v17 = vld [vmem:[#allocation2 + $0x178] sm:$0xff] }
 0x709   :  { %1937 = vmatpush.bf16.msra.mxu0 %v3764_v17 }
 0x70c   :  { %1695 = vmatpush.bf16.msrb.mxu2 %v3741_v23 }
 0x784   :  { %v1490_v26 = vpop.f32.mrf.mxu0 }
 0x789   :  { %v1429_v30 = vpop.f32.mrf.mxu3 }
 0x78a   :  { %v1491_v31 = vadd.f32 %v1490_v26, %v1429_v30  ;;  %v3755_v30 = vld [vmem:[#allocation2 + $0x130] sm:$0xff] }
 0x78b   :  { %1813 = vmatpush.bf16.msrb.mxu3 %v3755_v30 }
 0x78c   :  { %v1492_v32 = vpop.f32.mrf.mxu0  ;;  %v4133_v33 = vadd.f32 %v3861_v28, %v1491_v31  ;;  %v3863_v31 = vld [vmem:[#allocation4 + $0xe] ss:$0 sm:$0xff] }
 0x78e   :  { %v1498_v35 = vmul.f32 0.70710677, %v4133_v33  ;;  %v1497_v19 = vmul.f32 0.5, %v4133_v33  ;;  %v3754_v33 = vld [vmem:[#allocation2 + $0x128] sm:$0xff] }
 0x78f   :  { %1814 = vmatpush.bf16.msrb.mxu3 %v3754_v33  ;;  %v3759_v33 = vld [vmem:[#allocation2 + $0x150] sm:$0xff] }
 0x790   :  { %v1499_v36 = vmul.f32 %v1498_v35, %v1498_v35 }
 0x791   :  { %v1431_v38 = vpop.f32.mrf.mxu3 }
 0x792   :  { %v1500_v39 = vmin.f32 %v1499_v36, 16.0  ;;  %v3753_v36 = vld [vmem:[#allocation2 + $0x120] sm:$0xff] }
 0x793   :  { %1815 = vmatpush.bf16.msrb.mxu3 %v3753_v36  ;;  %v3758_v36 = vld [vmem:[#allocation2 + $0x148] sm:$0xff] }
 0x794   :  { %v1501_v40 = vmul.f32 2.1237322e-06, %v1500_v39  ;;  %v1512_v42 = vmul.f32 3.8918573e-05, %v1500_v39 }
 0x796   :  { %v1502_v43 = vadd.f32 0.00028619796, %v1501_v40  ;;  %v1513_v44 = vadd.f32 0.001143296, %v1512_v42  ;;  %v3752_v40 = vld [vmem:[#allocation2 + $0x118] sm:$0xff] }
 0x797   :  { %1816 = vmatpush.bf16.msrb.mxu3 %v3752_v40  ;;  %v3757_v40 = vld [vmem:[#allocation2 + $0x140] sm:$0xff] }
 0x798   :  { %v1503_v46 = vmul.f32 %v1502_v43, %v1500_v39  ;;  %v1514_v48 = vmul.f32 %v1513_v44, %v1500_v39 }
 0x79a   :  { %v1515_v49 = vadd.f32 0.014752088, %v1514_v48  ;;  %v1504_v50 = vadd.f32 0.0036580483, %v1503_v46  ;;  %v3751_v46 = vld [vmem:[#allocation2 + $0x110] sm:$0xff] }
 0x79b   :  { %1817 = vmatpush.bf16.msrb.mxu3 %v3751_v46 }
 0x79c   :  { %v1516_v53 = vmul.f32 %v1515_v49, %v1500_v39  ;;  %v1505_v55 = vmul.f32 %v1504_v50, %v1500_v39  ;;  %v3750_v49 = vld [vmem:[#allocation2 + $0x108] sm:$0xff] }
 0x79e   :  { %v1517_v54 = vadd.f32 0.112945676, %v1516_v53  ;;  %v1506_v59 = vadd.f32 0.05243302, %v1505_v55 }
 0x79f   :  { %1818 = vmatpush.bf16.msrb.mxu3 %v3750_v49 }
 0x7a0   :  { %v1518_v56 = vmul.f32 %v1517_v54, %v1500_v39  ;;  %v1507_v1 = vmul.f32 %v1506_v59, %v1500_v39  ;;  %v3749_v54 = vld [vmem:[#allocation2 + $0x100] sm:$0xff] }
 0x7a2   :  { %v1519_v58 = vadd.f32 0.4994258, %v1518_v56  ;;  %v1508_v2 = vadd.f32 0.18741608, %v1507_v1 }
 0x7a3   :  { %1819 = vmatpush.bf16.msrb.mxu3 %v3749_v54 }
 0x7a4   :  { %v1520_v62 = vmul.f32 %v1519_v58, %v1500_v39  ;;  %v1509_v5 = vmul.f32 %v1508_v2, %v1500_v39 }
 0x7a6   :  { %v1521_v0 = vadd.f32 1.0, %v1520_v62  ;;  %v1510_v45 = vadd.f32 1.1283791, %v1509_v5 }
 0x7a8   :  { %3866 = vrcp.f32 %v1521_v0  ;;  %v1533_v9 = vand.u32 2147483648, %v1521_v0  ;;  %v1531_v10 = vand.u32 2147483647, %v1521_v0  ;;  %vm1527_vm1 = vweird.f32 %v1521_v0 }
 0x7a9   :  { %v1511_v13 = vmul.f32 %v1510_v45, %v1498_v35 }
 0x7aa   :  { %v1534_v12 = vor.u32 1.1754944e-38, %v1533_v9  ;;  %vm1532_vm3 = vcmp.eq.f32.partialorder %v1531_v10, 8.507059e+37 }
 0x7ae   :  { %v3867_v4 = vpop.eup %3866 }
 0x7af   :  { %v1523_v6 = vmul.f32 %v3867_v4, %v1521_v0  ;;  %vm1528_vm0 = vweird.f32 %v3867_v4 }
 0x7b0   :  { %vm1529_vm2 = vmor %vm1527_vm1, %vm1528_vm0 }
 0x7b1   :  { %v1524_v7 = vsub.f32 1.0, %v1523_v6 }
 0x7b3   :  { %v1525_v61 = vmul.f32 %v3867_v4, %v1524_v7 }
 0x7b5   :  { %v1526_v11 = vadd.f32 %v3867_v4, %v1525_v61 }
 0x7b7   :  { %v1530_v14 = vsel %vm1529_vm2, %v3867_v4, %v1526_v11 }
 0x7b8   :  { %v1535_v15 = vsel %vm1532_vm3, %v1534_v12, %v1530_v14 }
 0x7b9   :  { %v1536_v16 = vmul.f32 %v1535_v15, %v1511_v13 }
 0x7bb   :  { %v3236_v18 = vclamps-f32 %v1536_v16, 1.0 }
 0x7bd   :  { %v1539_v20 = vadd.f32 1.0, %v3236_v18  ;;  %v3763_v18 = vld [vmem:[#allocation2 + $0x170] sm:$0xff] }
 0x7be   :  { %1938 = vmatpush.bf16.msra.mxu0 %v3763_v18 }
 0x7bf   :  { %v1540_v21 = vmul.f32 %v1539_v20, %v1497_v19  ;;  %v3864_v19 = vld [vmem:[#allocation4 + $0xf] ss:$0 sm:$0xff] }
 0x7c1   :  { %v1541_v22 = vpack.c.bf16 %v1540_v21, %v1540_v21  ;;  %v3762_v21 = vld [vmem:[#allocation2 + $0x168] sm:$0xff] }
 0x7c2   :  { %1939 = vmatpush.bf16.msra.mxu0 %v3762_v21 }
 0x7c3   :  { %1616 = vmatmul.bf16.vlgmr.msrb.gmra.mxu1 %v1541_v22 }
 0x840   :  { %v1617_v25 = vpop.f32.mrf.mxu1 }
 0x841   :  { %v1618_v26 = vadd.f32 %v3862_v24, %v1617_v25  ;;  %v3761_v24 = vld [vmem:[#allocation2 + $0x160] sm:$0xff] }
 0x842   :  { %1940 = vmatpush.bf16.msra.mxu0 %v3761_v24 }
 0x843   :  { %v1621_v27 = vpack.c.bf16 %v1618_v26, %v1618_v26 }
 0x845   :  { %1696 = vmatmul.bf16.vlgmr.msrb.gmra.mxu2 %v1621_v27 }
 0x848   :  { %v1619_v28 = vpop.f32.mrf.mxu1 }
 0x849   :  { %v3760_v28 = vld [vmem:[#allocation2 + $0x158] sm:$0xff] }
 0x84a   :  { %1941 = vmatpush.bf16.msra.mxu0 %v3760_v28 }
 0x84e   :  { %1942 = vmatpush.bf16.msra.mxu0 %v3759_v33 }
 0x852   :  { %1943 = vmatpush.bf16.msra.mxu0 %v3758_v36 }
 0x856   :  { %1944 = vmatpush.bf16.msra.mxu0 %v3757_v40 }
 0x8c8   :  { %v1697_v32 = vpop.f32.mrf.mxu2 }
 0x8c9   :  { %v1698_v34 = vadd.f32 %v3863_v31, %v1697_v32 }
 0x8cb   :  { %v1702_v35 = vmul.f32 0.70710677, %v1698_v34  ;;  %v1701_v13 = vmul.f32 0.5, %v1698_v34 }
 0x8cd   :  { %v1703_v37 = vmul.f32 %v1702_v35, %v1702_v35 }
 0x8cf   :  { %v1704_v38 = vmin.f32 %v1703_v37, 16.0 }
 0x8d0   :  { %v1699_v39 = vpop.f32.mrf.mxu2 }
 0x8d1   :  { %v1705_v41 = vmul.f32 2.1237322e-06, %v1704_v38  ;;  %v1716_v42 = vmul.f32 3.8918573e-05, %v1704_v38 }
 0x8d3   :  { %v1706_v43 = vadd.f32 0.00028619796, %v1705_v41  ;;  %v1717_v44 = vadd.f32 0.001143296, %v1716_v42 }
 0x8d5   :  { %v1707_v47 = vmul.f32 %v1706_v43, %v1704_v38  ;;  %v1718_v48 = vmul.f32 %v1717_v44, %v1704_v38 }
 0x8d7   :  { %v1719_v50 = vadd.f32 0.014752088, %v1718_v48  ;;  %v1708_v51 = vadd.f32 0.0036580483, %v1707_v47 }
 0x8d9   :  { %v1720_v53 = vmul.f32 %v1719_v50, %v1704_v38  ;;  %v1709_v56 = vmul.f32 %v1708_v51, %v1704_v38 }
 0x8db   :  { %v1721_v55 = vadd.f32 0.112945676, %v1720_v53  ;;  %v1710_v60 = vadd.f32 0.05243302, %v1709_v56 }
 0x8dd   :  { %v1722_v58 = vmul.f32 %v1721_v55, %v1704_v38  ;;  %v1711_v0 = vmul.f32 %v1710_v60, %v1704_v38 }
 0x8df   :  { %v1723_v59 = vadd.f32 0.4994258, %v1722_v58  ;;  %v1712_v1 = vadd.f32 0.18741608, %v1711_v0 }
 0x8e1   :  { %v1724_v62 = vmul.f32 %v1723_v59, %v1704_v38  ;;  %v1713_v2 = vmul.f32 %v1712_v1, %v1704_v38 }
 0x8e3   :  { %v1725_v63 = vadd.f32 1.0, %v1724_v62  ;;  %v1714_v6 = vadd.f32 1.1283791, %v1713_v2 }
 0x8e5   :  { %3868 = vrcp.f32 %v1725_v63  ;;  %v1737_v5 = vand.u32 2147483648, %v1725_v63  ;;  %v1735_v8 = vand.u32 2147483647, %v1725_v63  ;;  %vm1731_vm5 = vweird.f32 %v1725_v63 }
 0x8e6   :  { %v1715_v61 = vmul.f32 %v1714_v6, %v1702_v35 }
 0x8e7   :  { %v1738_v45 = vor.u32 1.1754944e-38, %v1737_v5  ;;  %vm1736_vm7 = vcmp.eq.f32.partialorder %v1735_v8, 8.507059e+37  ;;  %v3865_v8 = vld [vmem:[#allocation4 + $0x10] ss:$0 sm:$0xff] }
 0x8eb   :  { %v3869_v52 = vpop.eup %3868 }
 0x8ec   :  { %v1727_v3 = vmul.f32 %v3869_v52, %v1725_v63  ;;  %vm1732_vm4 = vweird.f32 %v3869_v52 }
 0x8ed   :  { %vm1733_vm6 = vmor %vm1731_vm5, %vm1732_vm4 }
 0x8ee   :  { %v1728_v4 = vsub.f32 1.0, %v1727_v3 }
 0x8f0   :  { %v1729_v7 = vmul.f32 %v3869_v52, %v1728_v4 }
 0x8f2   :  { %v1730_v9 = vadd.f32 %v3869_v52, %v1729_v7 }
 0x8f4   :  { %v1734_v10 = vsel %vm1733_vm6, %v3869_v52, %v1730_v9 }
 0x8f5   :  { %v1739_v11 = vsel %vm1736_vm7, %v1738_v45, %v1734_v10 }
 0x8f6   :  { %v1740_v57 = vmul.f32 %v1739_v11, %v1715_v61 }
 0x8f8   :  { %v3301_v12 = vclamps-f32 %v1740_v57, 1.0 }
 0x8fa   :  { %v1743_v14 = vadd.f32 1.0, %v3301_v12 }
 0x8fc   :  { %v1744_v15 = vmul.f32 %v1743_v14, %v1701_v13 }
 0x8fe   :  { %v1745_v16 = vpack.c.bf16 %v1744_v15, %v1744_v15 }
 0x900   :  { %1820 = vmatmul.bf16.vlgmr.msrb.gmra.mxu3 %v1745_v16 }
 0x983   :  { %v1821_v20 = vpop.f32.mrf.mxu3 }
 0x984   :  { %v1822_v22 = vadd.f32 %v3864_v19, %v1821_v20 }
 0x986   :  { %v1826_v23 = vmul.f32 0.70710677, %v1822_v22  ;;  %v1825_v4 = vmul.f32 0.5, %v1822_v22 }
 0x988   :  { %v1827_v25 = vmul.f32 %v1826_v23, %v1826_v23 }
 0x98a   :  { %v1828_v26 = vmin.f32 %v1827_v25, 16.0 }
 0x98b   :  { %v1823_v27 = vpop.f32.mrf.mxu3 }
 0x98c   :  { %v1829_v29 = vmul.f32 2.1237322e-06, %v1828_v26  ;;  %v1840_v30 = vmul.f32 3.8918573e-05, %v1828_v26 }
 0x98e   :  { %v1830_v31 = vadd.f32 0.00028619796, %v1829_v29  ;;  %v1841_v32 = vadd.f32 0.001143296, %v1840_v30 }
 0x990   :  { %v1831_v34 = vmul.f32 %v1830_v31, %v1828_v26  ;;  %v1842_v35 = vmul.f32 %v1841_v32, %v1828_v26 }
 0x992   :  { %v1843_v37 = vadd.f32 0.014752088, %v1842_v35  ;;  %v1832_v38 = vadd.f32 0.0036580483, %v1831_v34 }
 0x994   :  { %v1844_v39 = vmul.f32 %v1843_v37, %v1828_v26  ;;  %v1833_v42 = vmul.f32 %v1832_v38, %v1828_v26 }
 0x996   :  { %v1845_v41 = vadd.f32 0.112945676, %v1844_v39  ;;  %v1834_v46 = vadd.f32 0.05243302, %v1833_v42 }
 0x998   :  { %v1846_v43 = vmul.f32 %v1845_v41, %v1828_v26  ;;  %v1835_v49 = vmul.f32 %v1834_v46, %v1828_v26 }
 0x99a   :  { %v1847_v44 = vadd.f32 0.4994258, %v1846_v43  ;;  %v1836_v50 = vadd.f32 0.18741608, %v1835_v49 }
 0x99c   :  { %v1848_v47 = vmul.f32 %v1847_v44, %v1828_v26  ;;  %v1837_v53 = vmul.f32 %v1836_v50, %v1828_v26 }
 0x99e   :  { %v1849_v48 = vadd.f32 1.0, %v1848_v47  ;;  %v1838_v58 = vadd.f32 1.1283791, %v1837_v53 }
 0x9a0   :  { %3870 = vrcp.f32 %v1849_v48  ;;  %v1861_v56 = vand.u32 2147483648, %v1849_v48  ;;  %v1859_v60 = vand.u32 2147483647, %v1849_v48  ;;  %vm1855_vm9 = vweird.f32 %v1849_v48 }
 0x9a1   :  { %v1839_v0 = vmul.f32 %v1838_v58, %v1826_v23 }
 0x9a2   :  { %v1862_v63 = vor.u32 1.1754944e-38, %v1861_v56  ;;  %vm1860_vm11 = vcmp.eq.f32.partialorder %v1859_v60, 8.507059e+37 }
 0x9a6   :  { %v3871_v51 = vpop.eup %3870 }
 0x9a7   :  { %v1851_v54 = vmul.f32 %v3871_v51, %v1849_v48  ;;  %vm1856_vm8 = vweird.f32 %v3871_v51 }
 0x9a8   :  { %vm1857_vm10 = vmor %vm1855_vm9, %vm1856_vm8 }
 0x9a9   :  { %v1852_v55 = vsub.f32 1.0, %v1851_v54 }
 0x9ab   :  { %v1853_v59 = vmul.f32 %v3871_v51, %v1852_v55 }
 0x9ad   :  { %v1854_v62 = vadd.f32 %v3871_v51, %v1853_v59 }
 0x9af   :  { %v1858_v1 = vsel %vm1857_vm10, %v3871_v51, %v1854_v62 }
 0x9b0   :  { %v1863_v52 = vsel %vm1860_vm11, %v1862_v63, %v1858_v1 }
 0x9b1   :  { %v1864_v2 = vmul.f32 %v1863_v52, %v1839_v0 }
 0x9b3   :  { %v3334_v3 = vclamps-f32 %v1864_v2, 1.0 }
 0x9b5   :  { %v1867_v5 = vadd.f32 1.0, %v3334_v3 }
 0x9b7   :  { %v1868_v6 = vmul.f32 %v1867_v5, %v1825_v4 }
 0x9b9   :  { %v1869_v7 = vpack.c.bf16 %v1868_v6, %v1868_v6 }
 0x9bb   :  { %1945 = vmatmul.bf16.vlgmr.msra.gmra.mxu0 %v1869_v7 }
 0xa38   :  { %v1946_v9 = vpop.f32.mrf.mxu0 }
 0xa39   :  { %v1947_v45 = vadd.f32 %v3865_v8, %v1946_v9 }
 0xa40   :  { %v1948_v61 = vpop.f32.mrf.mxu0 }
 0xa41   :  { %4044 = dma.done.wait [#allocation3 + $0x1], 5120 }
 0xa42   :  { %4045 = vsyncadd [#allocation3 + $0x1], 4294962176  ;;  %s1952_s13 = scalar_lea.hbm %s4150_s2, 1408  ;;  %v1966_v17 = vpack.c.bf16 %v1947_v45, %v1947_v45  ;;  %v3872_v20 = vld [vmem:[#allocation4 + $0x11] ss:$0 sm:$0xff] }
 0xa43   :  { %s1960_s14 = sshll.u32 %s1952_s13, 4  ;;  %v3873_v61 = vld [vmem:[#allocation4 + $0x12] ss:$0 sm:$0xff]  ;;  %s1961_s14 = int_to_ptr.hbm [resolvable:$true] %s1960_s14 }
 0xa44   :  { %1965 = dma.hbm_to_vmem [thread:$0]  %s1961_s14, 3072, %s4079_s23, [#allocation3] }
 0xa45   :  { %v3772_v10 = vld [vmem:[#allocation2 + $0x1b8] sm:$0xff]  ;;  %v3771_v11 = vld [vmem:[#allocation2 + $0x1b0] sm:$0xff]  ;;  %v3770_v57 = vld [vmem:[#allocation2 + $0x1a8] sm:$0xff] }
 0xa46   :  { %2033 = vmatpush.bf16.msra.mxu1 %v3772_v10  ;;  %v3769_v12 = vld [vmem:[#allocation2 + $0x1a0] sm:$0xff]  ;;  %v3768_v13 = vld [vmem:[#allocation2 + $0x198] sm:$0xff]  ;;  %v3767_v14 = vld [vmem:[#allocation2 + $0x190] sm:$0xff] }
 0xa47   :  { %v3766_v15 = vld [vmem:[#allocation2 + $0x188] sm:$0xff]  ;;  %v3765_v16 = vld [vmem:[#allocation2 + $0x180] sm:$0xff]  ;;  %v3780_v18 = vld [vmem:[#allocation2 + $0x1f8] sm:$0xff] }
 0xa48   :  { %2157 = vmatpush.bf16.msra.mxu2 %v3780_v18  ;;  %v3779_v19 = vld [vmem:[#allocation2 + $0x1f0] sm:$0xff]  ;;  %v3778_v21 = vld [vmem:[#allocation2 + $0x1e8] sm:$0xff]  ;;  %v3777_v24 = vld [vmem:[#allocation2 + $0x1e0] sm:$0xff] }
 0xa49   :  { %v3776_v27 = vld [vmem:[#allocation2 + $0x1d8] sm:$0xff]  ;;  %v3775_v31 = vld [vmem:[#allocation2 + $0x1d0] sm:$0xff]  ;;  %v3774_v36 = vld [vmem:[#allocation2 + $0x1c8] sm:$0xff] }
 0xa4a   :  { %2034 = vmatpush.bf16.msra.mxu1 %v3771_v11  ;;  %v3773_v40 = vld [vmem:[#allocation2 + $0x1c0] sm:$0xff]  ;;  %v3788_v9 = vld [vmem:[#allocation2 + $0x238] sm:$0xff]  ;;  %v3787_v45 = vld [vmem:[#allocation2 + $0x230] sm:$0xff] }
 0xa4b   :  { %2281 = vmatpush.bf16.msra.mxu3 %v3788_v9  ;;  %v3786_v10 = vld [vmem:[#allocation2 + $0x228] sm:$0xff] }
 0xa4c   :  { %2158 = vmatpush.bf16.msra.mxu2 %v3779_v19 }
 0xa4e   :  { %2035 = vmatpush.bf16.msra.mxu1 %v3770_v57 }
 0xa4f   :  { %2282 = vmatpush.bf16.msra.mxu3 %v3787_v45  ;;  %v3804_v45 = vld [vmem:[#allocation2 + $0x2b8] sm:$0xff] }
 0xa50   :  { %2159 = vmatpush.bf16.msra.mxu2 %v3778_v21 }
 0xa52   :  { %2036 = vmatpush.bf16.msra.mxu1 %v3769_v12  ;;  %v3785_v12 = vld [vmem:[#allocation2 + $0x220] sm:$0xff] }
 0xa53   :  { %2283 = vmatpush.bf16.msra.mxu3 %v3786_v10  ;;  %v3875_v10 = vld [vmem:[#allocation4 + $0x14] ss:$0 sm:$0xff] }
 0xa54   :  { %2160 = vmatpush.bf16.msra.mxu2 %v3777_v24 }
 0xa56   :  { %2037 = vmatpush.bf16.msra.mxu1 %v3768_v13 }
 0xa57   :  { %2284 = vmatpush.bf16.msra.mxu3 %v3785_v12 }
 0xa58   :  { %2161 = vmatpush.bf16.msra.mxu2 %v3776_v27 }
 0xa5a   :  { %2038 = vmatpush.bf16.msra.mxu1 %v3767_v14 }
 0xa5c   :  { %2162 = vmatpush.bf16.msra.mxu2 %v3775_v31 }
 0xa5e   :  { %2039 = vmatpush.bf16.msra.mxu1 %v3766_v15  ;;  %v3784_v15 = vld [vmem:[#allocation2 + $0x218] sm:$0xff] }
 0xa5f   :  { %2285 = vmatpush.bf16.msra.mxu3 %v3784_v15 }
 0xa60   :  { %2163 = vmatpush.bf16.msra.mxu2 %v3774_v36 }
 0xa62   :  { %2040 = vmatpush.bf16.msra.mxu1 %v3765_v16 }
 0xa64   :  { %2164 = vmatpush.bf16.msra.mxu2 %v3773_v40  ;;  %v3794_v40 = vld [vmem:[#allocation2 + $0x268] sm:$0xff] }
 0xa65   :  { %2041 = vmatmul.bf16.vlgmr.msra.gmra.mxu1 %v1966_v17 }
 0xa66   :  { %2485 = vmatpush.bf16.msrb.mxu1 %v3804_v45 }
 0xae2   :  { %v2042_v22 = vpop.f32.mrf.mxu1 }
 0xae3   :  { %v2043_v23 = vadd.f32 %v3872_v20, %v2042_v22  ;;  %v3783_v20 = vld [vmem:[#allocation2 + $0x210] sm:$0xff] }
 0xae4   :  { %2286 = vmatpush.bf16.msra.mxu3 %v3783_v20 }
 0xae5   :  { %v2047_v25 = vmul.f32 0.70710677, %v2043_v23  ;;  %v2046_v5 = vmul.f32 0.5, %v2043_v23 }
 0xae7   :  { %v2048_v26 = vmul.f32 %v2047_v25, %v2047_v25 }
 0xae9   :  { %v2049_v28 = vmin.f32 %v2048_v26, 16.0 }
 0xaea   :  { %v2044_v29 = vpop.f32.mrf.mxu1 }
 0xaeb   :  { %v2050_v30 = vmul.f32 2.1237322e-06, %v2049_v28  ;;  %v2061_v32 = vmul.f32 3.8918573e-05, %v2049_v28  ;;  %v3781_v29 = vld [vmem:[#allocation2 + $0x200] sm:$0xff] }
 0xaed   :  { %v2051_v33 = vadd.f32 0.00028619796, %v2050_v30  ;;  %v2062_v34 = vadd.f32 0.001143296, %v2061_v32 }
 0xaef   :  { %v2052_v35 = vmul.f32 %v2051_v33, %v2049_v28  ;;  %v2063_v37 = vmul.f32 %v2062_v34, %v2049_v28 }
 0xaf1   :  { %v2064_v38 = vadd.f32 0.014752088, %v2063_v37  ;;  %v2053_v39 = vadd.f32 0.0036580483, %v2052_v35  ;;  %v3796_v35 = vld [vmem:[#allocation2 + $0x278] sm:$0xff]  ;;  %v3795_v37 = vld [vmem:[#allocation2 + $0x270] sm:$0xff] }
 0xaf2   :  { %2361 = vmatpush.bf16.msrb.mxu0 %v3796_v35 }
 0xaf3   :  { %v2065_v41 = vmul.f32 %v2064_v38, %v2049_v28  ;;  %v2054_v43 = vmul.f32 %v2053_v39, %v2049_v28 }
 0xaf5   :  { %v2066_v42 = vadd.f32 0.112945676, %v2065_v41  ;;  %v2055_v47 = vadd.f32 0.05243302, %v2054_v43 }
 0xaf6   :  { %2362 = vmatpush.bf16.msrb.mxu0 %v3795_v37 }
 0xaf7   :  { %v2067_v44 = vmul.f32 %v2066_v42, %v2049_v28  ;;  %v2056_v50 = vmul.f32 %v2055_v47, %v2049_v28  ;;  %v3793_v42 = vld [vmem:[#allocation2 + $0x260] sm:$0xff] }
 0xaf9   :  { %v2068_v46 = vadd.f32 0.4994258, %v2067_v44  ;;  %v2057_v51 = vadd.f32 0.18741608, %v2056_v50 }
 0xafa   :  { %2363 = vmatpush.bf16.msrb.mxu0 %v3794_v40 }
 0xafb   :  { %v2069_v48 = vmul.f32 %v2068_v46, %v2049_v28  ;;  %v2058_v54 = vmul.f32 %v2057_v51, %v2049_v28 }
 0xafd   :  { %v2070_v49 = vadd.f32 1.0, %v2069_v48  ;;  %v2059_v59 = vadd.f32 1.1283791, %v2058_v54  ;;  %v3792_v48 = vld [vmem:[#allocation2 + $0x258] sm:$0xff] }
 0xafe   :  { %2364 = vmatpush.bf16.msrb.mxu0 %v3793_v42 }
 0xaff   :  { %3877 = vrcp.f32 %v2070_v49  ;;  %v2082_v58 = vand.u32 2147483648, %v2070_v49  ;;  %v2080_v62 = vand.u32 2147483647, %v2070_v49  ;;  %vm2076_vm13 = vweird.f32 %v2070_v49 }
 0xb00   :  { %v2060_v1 = vmul.f32 %v2059_v59, %v2047_v25  ;;  %v3782_v25 = vld [vmem:[#allocation2 + $0x208] sm:$0xff] }
 0xb01   :  { %v2083_v0 = vor.u32 1.1754944e-38, %v2082_v58  ;;  %vm2081_vm15 = vcmp.eq.f32.partialorder %v2080_v62, 8.507059e+37  ;;  %2287 = vmatpush.bf16.msra.mxu3 %v3782_v25 }
 0xb02   :  { %2365 = vmatpush.bf16.msrb.mxu0 %v3792_v48 }
 0xb05   :  { %v3878_v53 = vpop.eup %3877  ;;  %2288 = vmatpush.bf16.msra.mxu3 %v3781_v29 }
 0xb06   :  { %v2072_v55 = vmul.f32 %v3878_v53, %v2070_v49  ;;  %vm2077_vm12 = vweird.f32 %v3878_v53 }
 0xb07   :  { %vm2078_vm14 = vmor %vm2076_vm13, %vm2077_vm12 }
 0xb08   :  { %v2073_v56 = vsub.f32 1.0, %v2072_v55  ;;  %v3791_v55 = vld [vmem:[#allocation2 + $0x250] sm:$0xff] }
 0xb09   :  { %2366 = vmatpush.bf16.msrb.mxu0 %v3791_v55 }
 0xb0a   :  { %v2074_v60 = vmul.f32 %v3878_v53, %v2073_v56 }
 0xb0c   :  { %v2075_v63 = vadd.f32 %v3878_v53, %v2074_v60 }
 0xb0e   :  { %v2079_v52 = vsel %vm2078_vm14, %v3878_v53, %v2075_v63  ;;  %v3790_v63 = vld [vmem:[#allocation2 + $0x248] sm:$0xff] }
 0xb0f   :  { %v2084_v2 = vsel %vm2081_vm15, %v2083_v0, %v2079_v52  ;;  %2367 = vmatpush.bf16.msrb.mxu0 %v3790_v63  ;;  %v3876_v63 = vld [vmem:[#allocation4 + $0x15] ss:$0 sm:$0xff] }
 0xb10   :  { %v2085_v3 = vmul.f32 %v2084_v2, %v2060_v1 }
 0xb12   :  { %v3399_v4 = vclamps-f32 %v2085_v3, 1.0 }
 0xb14   :  { %v2088_v6 = vadd.f32 1.0, %v3399_v4  ;;  %v3789_v4 = vld [vmem:[#allocation2 + $0x240] sm:$0xff] }
 0xb15   :  { %2368 = vmatpush.bf16.msrb.mxu0 %v3789_v4 }
 0xb16   :  { %v2089_v7 = vmul.f32 %v2088_v6, %v2046_v5  ;;  %v3874_v5 = vld [vmem:[#allocation4 + $0x13] ss:$0 sm:$0xff] }
 0xb18   :  { %v2090_v8 = vpack.c.bf16 %v2089_v7, %v2089_v7 }
 0xb1a   :  { %2165 = vmatmul.bf16.vlgmr.msra.gmra.mxu2 %v2090_v8 }
 0xb9d   :  { %v2166_v11 = vpop.f32.mrf.mxu2 }
 0xb9e   :  { %v4141_v57 = vadd.f32 %v3873_v61, %v2166_v11  ;;  %v3803_v61 = vld [vmem:[#allocation2 + $0x2b0] sm:$0xff] }
 0xb9f   :  { %2486 = vmatpush.bf16.msrb.mxu1 %v3803_v61 }
 0xba0   :  { %v2171_v13 = vmul.f32 0.70710677, %v4141_v57  ;;  %v2170_v1 = vmul.f32 0.5, %v4141_v57  ;;  %v3802_v57 = vld [vmem:[#allocation2 + $0x2a8] sm:$0xff] }
 0xba2   :  { %v2172_v14 = vmul.f32 %v2171_v13, %v2171_v13 }
 0xba3   :  { %2487 = vmatpush.bf16.msrb.mxu1 %v3802_v57 }
 0xba4   :  { %v2173_v16 = vmin.f32 %v2172_v14, 16.0  ;;  %v3801_v14 = vld [vmem:[#allocation2 + $0x2a0] sm:$0xff] }
 0xba5   :  { %v2168_v17 = vpop.f32.mrf.mxu2 }
 0xba6   :  { %v2174_v18 = vmul.f32 2.1237322e-06, %v2173_v16  ;;  %v2185_v19 = vmul.f32 3.8918573e-05, %v2173_v16 }
 0xba7   :  { %2488 = vmatpush.bf16.msrb.mxu1 %v3801_v14 }
 0xba8   :  { %v2175_v21 = vadd.f32 0.00028619796, %v2174_v18  ;;  %v2186_v22 = vadd.f32 0.001143296, %v2185_v19  ;;  %v3800_v18 = vld [vmem:[#allocation2 + $0x298] sm:$0xff] }
 0xbaa   :  { %v2176_v23 = vmul.f32 %v2175_v21, %v2173_v16  ;;  %v2187_v24 = vmul.f32 %v2186_v22, %v2173_v16 }
 0xbab   :  { %2489 = vmatpush.bf16.msrb.mxu1 %v3800_v18 }
 0xbac   :  { %v2188_v26 = vadd.f32 0.014752088, %v2187_v24  ;;  %v2177_v27 = vadd.f32 0.0036580483, %v2176_v23  ;;  %v3799_v23 = vld [vmem:[#allocation2 + $0x290] sm:$0xff] }
 0xbae   :  { %v2189_v28 = vmul.f32 %v2188_v26, %v2173_v16  ;;  %v2178_v31 = vmul.f32 %v2177_v27, %v2173_v16  ;;  %v3798_v26 = vld [vmem:[#allocation2 + $0x288] sm:$0xff] }
 0xbaf   :  { %2490 = vmatpush.bf16.msrb.mxu1 %v3799_v23 }
 0xbb0   :  { %v2190_v30 = vadd.f32 0.112945676, %v2189_v28  ;;  %v2179_v34 = vadd.f32 0.05243302, %v2178_v31 }
 0xbb2   :  { %v2191_v32 = vmul.f32 %v2190_v30, %v2173_v16  ;;  %v2180_v39 = vmul.f32 %v2179_v34, %v2173_v16  ;;  %v3797_v30 = vld [vmem:[#allocation2 + $0x280] sm:$0xff] }
 0xbb3   :  { %2491 = vmatpush.bf16.msrb.mxu1 %v3798_v26 }
 0xbb4   :  { %v2192_v33 = vadd.f32 0.4994258, %v2191_v32  ;;  %v2181_v41 = vadd.f32 0.18741608, %v2180_v39 }
 0xbb6   :  { %v2193_v36 = vmul.f32 %v2192_v33, %v2173_v16  ;;  %v2182_v44 = vmul.f32 %v2181_v41, %v2173_v16 }
 0xbb7   :  { %2492 = vmatpush.bf16.msrb.mxu1 %v3797_v30 }
 0xbb8   :  { %v2194_v38 = vadd.f32 1.0, %v2193_v36  ;;  %v2183_v50 = vadd.f32 1.1283791, %v2182_v44 }
 0xbba   :  { %3879 = vrcp.f32 %v2194_v38  ;;  %v2206_v49 = vand.u32 2147483648, %v2194_v38  ;;  %v2204_v53 = vand.u32 2147483647, %v2194_v38  ;;  %vm2200_vm1 = vweird.f32 %v2194_v38 }
 0xbbb   :  { %v2184_v58 = vmul.f32 %v2183_v50, %v2171_v13 }
 0xbbc   :  { %v2207_v56 = vor.u32 1.1754944e-38, %v2206_v49  ;;  %vm2205_vm3 = vcmp.eq.f32.partialorder %v2204_v53, 8.507059e+37 }
 0xbc0   :  { %v3880_v43 = vpop.eup %3879 }
 0xbc1   :  { %v2196_v46 = vmul.f32 %v3880_v43, %v2194_v38  ;;  %vm2201_vm0 = vweird.f32 %v3880_v43 }
 0xbc2   :  { %vm2202_vm2 = vmor %vm2200_vm1, %vm2201_vm0 }
 0xbc3   :  { %v2197_v47 = vsub.f32 1.0, %v2196_v46 }
 0xbc5   :  { %v2198_v51 = vmul.f32 %v3880_v43, %v2197_v47 }
 0xbc7   :  { %v2199_v54 = vadd.f32 %v3880_v43, %v2198_v51 }
 0xbc9   :  { %v2203_v59 = vsel %vm2202_vm2, %v3880_v43, %v2199_v54 }
 0xbca   :  { %v2208_v60 = vsel %vm2205_vm3, %v2207_v56, %v2203_v59 }
 0xbcb   :  { %v2209_v62 = vmul.f32 %v2208_v60, %v2184_v58 }
 0xbcd   :  { %v3432_v0 = vclamps-f32 %v2209_v62, 1.0 }
 0xbcf   :  { %v2212_v52 = vadd.f32 1.0, %v3432_v0 }
 0xbd1   :  { %v2213_v2 = vmul.f32 %v2212_v52, %v2170_v1 }
 0xbd3   :  { %v2214_v3 = vpack.c.bf16 %v2213_v2, %v2213_v2 }
 0xbd5   :  { %2289 = vmatmul.bf16.vlgmr.msra.gmra.mxu3 %v2214_v3 }
 0xc58   :  { %v2290_v6 = vpop.f32.mrf.mxu3 }
 0xc59   :  { %v2291_v7 = vadd.f32 %v3874_v5, %v2290_v6 }
 0xc5b   :  { %v2294_v8 = vpack.c.bf16 %v2291_v7, %v2291_v7 }
 0xc5d   :  { %2369 = vmatmul.bf16.vlgmr.msrb.gmra.mxu0 %v2294_v8 }
 0xc60   :  { %v2292_v9 = vpop.f32.mrf.mxu3 }
 0xcda   :  { %v2370_v11 = vpop.f32.mrf.mxu0 }
 0xcdb   :  { %v2371_v12 = vadd.f32 %v3875_v10, %v2370_v11 }
 0xcdd   :  { %v2375_v13 = vmul.f32 0.70710677, %v2371_v12  ;;  %v2374_v58 = vmul.f32 0.5, %v2371_v12 }
 0xcdf   :  { %v2376_v15 = vmul.f32 %v2375_v13, %v2375_v13 }
 0xce1   :  { %v2377_v16 = vmin.f32 %v2376_v15, 16.0 }
 0xce2   :  { %v2372_v17 = vpop.f32.mrf.mxu0 }
 0xce3   :  { %v2378_v19 = vmul.f32 2.1237322e-06, %v2377_v16  ;;  %v2389_v20 = vmul.f32 3.8918573e-05, %v2377_v16 }
 0xce5   :  { %v2379_v21 = vadd.f32 0.00028619796, %v2378_v19  ;;  %v2390_v22 = vadd.f32 0.001143296, %v2389_v20 }
 0xce7   :  { %v2380_v24 = vmul.f32 %v2379_v21, %v2377_v16  ;;  %v2391_v25 = vmul.f32 %v2390_v22, %v2377_v16 }
 0xce9   :  { %v2392_v27 = vadd.f32 0.014752088, %v2391_v25  ;;  %v2381_v28 = vadd.f32 0.0036580483, %v2380_v24 }
 0xceb   :  { %v2393_v29 = vmul.f32 %v2392_v27, %v2377_v16  ;;  %v2382_v32 = vmul.f32 %v2381_v28, %v2377_v16 }
 0xced   :  { %v2394_v31 = vadd.f32 0.112945676, %v2393_v29  ;;  %v2383_v35 = vadd.f32 0.05243302, %v2382_v32 }
 0xcef   :  { %v2395_v33 = vmul.f32 %v2394_v31, %v2377_v16  ;;  %v2384_v38 = vmul.f32 %v2383_v35, %v2377_v16 }
 0xcf1   :  { %v2396_v34 = vadd.f32 0.4994258, %v2395_v33  ;;  %v2385_v39 = vadd.f32 0.18741608, %v2384_v38 }
 0xcf3   :  { %v2397_v36 = vmul.f32 %v2396_v34, %v2377_v16  ;;  %v2386_v41 = vmul.f32 %v2385_v39, %v2377_v16 }
 0xcf5   :  { %v2398_v37 = vadd.f32 1.0, %v2397_v36  ;;  %v2387_v46 = vadd.f32 1.1283791, %v2386_v41 }
 0xcf7   :  { %3881 = vrcp.f32 %v2398_v37  ;;  %v2410_v44 = vand.u32 2147483648, %v2398_v37  ;;  %v2408_v48 = vand.u32 2147483647, %v2398_v37  ;;  %vm2404_vm5 = vweird.f32 %v2398_v37 }
 0xcf8   :  { %v2388_v51 = vmul.f32 %v2387_v46, %v2375_v13 }
 0xcf9   :  { %v2411_v50 = vor.u32 1.1754944e-38, %v2410_v44  ;;  %vm2409_vm7 = vcmp.eq.f32.partialorder %v2408_v48, 8.507059e+37 }
 0xcfd   :  { %v3882_v40 = vpop.eup %3881 }
 0xcfe   :  { %v2400_v42 = vmul.f32 %v3882_v40, %v2398_v37  ;;  %vm2405_vm4 = vweird.f32 %v3882_v40 }
 0xcff   :  { %vm2406_vm6 = vmor %vm2404_vm5, %vm2405_vm4 }
 0xd00   :  { %v2401_v43 = vsub.f32 1.0, %v2400_v42 }
 0xd02   :  { %v2402_v47 = vmul.f32 %v3882_v40, %v2401_v43 }
 0xd04   :  { %v2403_v49 = vadd.f32 %v3882_v40, %v2402_v47 }
 0xd06   :  { %v2407_v53 = vsel %vm2406_vm6, %v3882_v40, %v2403_v49 }
 0xd07   :  { %v2412_v54 = vsel %vm2409_vm7, %v2411_v50, %v2407_v53 }
 0xd08   :  { %v2413_v55 = vmul.f32 %v2412_v54, %v2388_v51 }
 0xd0a   :  { %v3497_v56 = vclamps-f32 %v2413_v55, 1.0 }
 0xd0c   :  { %v2416_v59 = vadd.f32 1.0, %v3497_v56 }
 0xd0e   :  { %v2417_v60 = vmul.f32 %v2416_v59, %v2374_v58 }
 0xd10   :  { %v2418_v62 = vpack.c.bf16 %v2417_v60, %v2417_v60 }
 0xd12   :  { %2493 = vmatmul.bf16.vlgmr.msrb.gmra.mxu1 %v2418_v62 }
 0xd8f   :  { %v2494_v0 = vpop.f32.mrf.mxu1 }
 0xd90   :  { %v2495_v1 = vadd.f32 %v3876_v63, %v2494_v0 }
 0xd92   :  { %v2499_v52 = vmul.f32 0.70710677, %v2495_v1  ;;  %v2498_v35 = vmul.f32 0.5, %v2495_v1 }
 0xd94   :  { %v2500_v2 = vmul.f32 %v2499_v52, %v2499_v52 }
 0xd96   :  { %v2501_v3 = vmin.f32 %v2500_v2, 16.0 }
 0xd97   :  { %v2496_v4 = vpop.f32.mrf.mxu1 }
 0xd98   :  { %v2502_v5 = vmul.f32 2.1237322e-06, %v2501_v3  ;;  %v2513_v6 = vmul.f32 3.8918573e-05, %v2501_v3 }
 0xd9a   :  { %v2503_v7 = vadd.f32 0.00028619796, %v2502_v5  ;;  %v2514_v8 = vadd.f32 0.001143296, %v2513_v6 }
 0xd9c   :  { %v2504_v9 = vmul.f32 %v2503_v7, %v2501_v3  ;;  %v2515_v45 = vmul.f32 %v2514_v8, %v2501_v3 }
 0xd9e   :  { %v2516_v61 = vadd.f32 0.014752088, %v2515_v45  ;;  %v2505_v10 = vadd.f32 0.0036580483, %v2504_v9 }
 0xda0   :  { %v2517_v11 = vmul.f32 %v2516_v61, %v2501_v3  ;;  %v2506_v12 = vmul.f32 %v2505_v10, %v2501_v3 }
 0xda2   :  { %v2518_v57 = vadd.f32 0.112945676, %v2517_v11  ;;  %v2507_v15 = vadd.f32 0.05243302, %v2506_v12 }
 0xda4   :  { %v2519_v13 = vmul.f32 %v2518_v57, %v2501_v3  ;;  %v2508_v18 = vmul.f32 %v2507_v15, %v2501_v3 }
 0xda6   :  { %v2520_v14 = vadd.f32 0.4994258, %v2519_v13  ;;  %v2509_v19 = vadd.f32 0.18741608, %v2508_v18 }
 0xda8   :  { %v2521_v16 = vmul.f32 %v2520_v14, %v2501_v3  ;;  %v2510_v21 = vmul.f32 %v2509_v19, %v2501_v3 }
 0xdaa   :  { %v2522_v17 = vadd.f32 1.0, %v2521_v16  ;;  %v2511_v25 = vadd.f32 1.1283791, %v2510_v21 }
 0xdac   :  { %3883 = vrcp.f32 %v2522_v17  ;;  %v2534_v24 = vand.u32 2147483648, %v2522_v17  ;;  %v2532_v27 = vand.u32 2147483647, %v2522_v17  ;;  %vm2528_vm9 = vweird.f32 %v2522_v17 }
 0xdad   :  { %v2512_v30 = vmul.f32 %v2511_v25, %v2499_v52 }
 0xdae   :  { %v2535_v29 = vor.u32 1.1754944e-38, %v2534_v24  ;;  %vm2533_vm11 = vcmp.eq.f32.partialorder %v2532_v27, 8.507059e+37 }
 0xdb2   :  { %v3884_v20 = vpop.eup %3883 }
 0xdb3   :  { %v2524_v22 = vmul.f32 %v3884_v20, %v2522_v17  ;;  %vm2529_vm8 = vweird.f32 %v3884_v20 }
 0xdb4   :  { %vm2530_vm10 = vmor %vm2528_vm9, %vm2529_vm8 }
 0xdb5   :  { %v2525_v23 = vsub.f32 1.0, %v2524_v22 }
 0xdb7   :  { %v2526_v26 = vmul.f32 %v3884_v20, %v2525_v23 }
 0xdb9   :  { %v2527_v28 = vadd.f32 %v3884_v20, %v2526_v26 }
 0xdbb   :  { %v2531_v31 = vsel %vm2530_vm10, %v3884_v20, %v2527_v28 }
 0xdbc   :  { %v2536_v32 = vsel %vm2533_vm11, %v2535_v29, %v2531_v31 }
 0xdbd   :  { %v2537_v33 = vmul.f32 %v2536_v32, %v2512_v30 }
 0xdbf   :  { %v3530_v34 = vclamps-f32 %v2537_v33, 1.0 }
 0xdc1   :  { %v2540_v36 = vadd.f32 1.0, %v3530_v34 }
 0xdc3   :  { %v2541_v37 = vmul.f32 %v2540_v36, %v2498_v35 }
 0xdc4   :  { %4046 = dma.done.wait [#allocation3], 3072 }
 0xdc5   :  { %4047 = vsyncadd [#allocation3], 4294964224  ;;  %v3812_v38 = vld [vmem:[#allocation2 + $0x38] sm:$0xff]  ;;  %v3811_v39 = vld [vmem:[#allocation2 + $0x30] sm:$0xff]  ;;  %v2547_v55 = vpack.c.bf16 %v2541_v37, %v2541_v37  ;;  %vm2792_vm12 = vcmask 7168  }
 0xdc6   :  { %2614 = vmatpush.bf16.msrb.mxu2 %v3812_v38  ;;  %v3820_v40 = vld [vmem:[#allocation2 + $0x78] sm:$0xff]  ;;  %v3819_v41 = vld [vmem:[#allocation2 + $0x70] sm:$0xff]  ;;  %v3810_v42 = vld [vmem:[#allocation2 + $0x28] sm:$0xff] }
 0xdc7   :  { %2694 = vmatpush.bf16.msrb.mxu3 %v3820_v40  ;;  %v3818_v43 = vld [vmem:[#allocation2 + $0x68] sm:$0xff]  ;;  %v3809_v44 = vld [vmem:[#allocation2 + $0x20] sm:$0xff]  ;;  %v3808_v47 = vld [vmem:[#allocation2 + $0x18] sm:$0xff] }
 0xdc8   :  { %v3817_v46 = vld [vmem:[#allocation2 + $0x60] sm:$0xff]  ;;  %v3816_v48 = vld [vmem:[#allocation2 + $0x58] sm:$0xff]  ;;  %v3807_v49 = vld [vmem:[#allocation2 + $0x10] sm:$0xff] }
 0xdc9   :  { %v3815_v50 = vld [vmem:[#allocation2 + $0x50] sm:$0xff]  ;;  %v3806_v51 = vld [vmem:[#allocation2 + $0x8] sm:$0xff]  ;;  %v3805_v54 = vld [vmem:[#allocation2] sm:$0xff] }
 0xdca   :  { %2615 = vmatpush.bf16.msrb.mxu2 %v3811_v39  ;;  %v3814_v53 = vld [vmem:[#allocation2 + $0x48] sm:$0xff]  ;;  %v3813_v56 = vld [vmem:[#allocation2 + $0x40] sm:$0xff]  ;;  %v3828_v58 = vld [vmem:[#allocation2 + $0xb8] sm:$0xff] }
 0xdcb   :  { %2695 = vmatpush.bf16.msrb.mxu3 %v3819_v41  ;;  %2774 = vmatpush.bf16.msra.mxu0 %v3828_v58  ;;  %v3827_v59 = vld [vmem:[#allocation2 + $0xb0] sm:$0xff]  ;;  %v3826_v60 = vld [vmem:[#allocation2 + $0xa8] sm:$0xff]  ;;  %v3825_v62 = vld [vmem:[#allocation2 + $0xa0] sm:$0xff] }
 0xdcc   :  { %v3824_v63 = vld [vmem:[#allocation2 + $0x98] sm:$0xff]  ;;  %v3823_v0 = vld [vmem:[#allocation2 + $0x90] sm:$0xff]  ;;  %v3822_v52 = vld [vmem:[#allocation2 + $0x88] sm:$0xff] }
 0xdcd   :  { %v3885_v1 = vld [vmem:[#allocation4 + $0x16] ss:$0 sm:$0xff]  ;;  %v3821_v6 = vld [vmem:[#allocation2 + $0x80] sm:$0xff]  ;;  %v3886_v7 = vld [vmem:[#allocation4 + $0x17] ss:$0 sm:$0xff] }
 0xdce   :  { %2616 = vmatpush.bf16.msrb.mxu2 %v3810_v42  ;;  %v3887_v10 = vld [vmem:[#allocation4 + $0x18] ss:$0 sm:$0xff] }
 0xdcf   :  { %2696 = vmatpush.bf16.msrb.mxu3 %v3818_v43  ;;  %2775 = vmatpush.bf16.msra.mxu0 %v3827_v59 }
 0xdd2   :  { %2617 = vmatpush.bf16.msrb.mxu2 %v3809_v44 }
 0xdd3   :  { %2697 = vmatpush.bf16.msrb.mxu3 %v3817_v46  ;;  %2776 = vmatpush.bf16.msra.mxu0 %v3826_v60 }
 0xdd6   :  { %2618 = vmatpush.bf16.msrb.mxu2 %v3808_v47 }
 0xdd7   :  { %2698 = vmatpush.bf16.msrb.mxu3 %v3816_v48  ;;  %2777 = vmatpush.bf16.msra.mxu0 %v3825_v62 }
 0xdda   :  { %2619 = vmatpush.bf16.msrb.mxu2 %v3807_v49 }
 0xddb   :  { %2699 = vmatpush.bf16.msrb.mxu3 %v3815_v50  ;;  %2778 = vmatpush.bf16.msra.mxu0 %v3824_v63 }
 0xdde   :  { %2620 = vmatpush.bf16.msrb.mxu2 %v3806_v51 }
 0xddf   :  { %2700 = vmatpush.bf16.msrb.mxu3 %v3814_v53  ;;  %2779 = vmatpush.bf16.msra.mxu0 %v3823_v0 }
 0xde2   :  { %2621 = vmatpush.bf16.msrb.mxu2 %v3805_v54 }
 0xde3   :  { %2701 = vmatpush.bf16.msrb.mxu3 %v3813_v56  ;;  %2780 = vmatpush.bf16.msra.mxu0 %v3822_v52 }
 0xde5   :  { %2622 = vmatmul.bf16.vlgmr.msrb.gmra.mxu2 %v2547_v55 }
 0xde7   :  { %2781 = vmatpush.bf16.msra.mxu0 %v3821_v6 }
 0xe68   :  { %v2623_v2 = vpop.f32.mrf.mxu2 }
 0xe69   :  { %v2624_v3 = vadd.f32 %v3885_v1, %v2623_v2 }
 0xe6b   :  { %v2627_v4 = vpack.c.bf16 %v2624_v3, %v2624_v3 }
 0xe6d   :  { %2702 = vmatmul.bf16.vlgmr.msrb.gmra.mxu3 %v2627_v4 }
 0xe70   :  { %v2625_v5 = vpop.f32.mrf.mxu2 }
 0xef0   :  { %v2703_v8 = vpop.f32.mrf.mxu3 }
 0xef1   :  { %v2704_v9 = vadd.f32 %v3886_v7, %v2703_v8 }
 0xef3   :  { %v2707_v45 = vpack.c.bf16 %v2704_v9, %v2704_v9 }
 0xef5   :  { %2782 = vmatmul.bf16.vlgmr.msra.gmra.mxu0 %v2707_v45 }
 0xef8   :  { %v2705_v61 = vpop.f32.mrf.mxu3 }
 0xf72   :  { %v2783_v11 = vpop.f32.mrf.mxu0 }
 0xf73   :  { %v2784_v57 = vadd.f32 %v3887_v10, %v2783_v11 }
 0xf75   :  { %v2787_v12 = vsub.f32 0.0, %v2784_v57 }
 0xf77   :  { %v2788_v13 = vmul.f32 1.442695, %v2787_v12 }
 0xf79   :  { %3888 = vpow2.f32 %v2788_v13 }
 0xf7a   :  { %v2785_v14 = vpop.f32.mrf.mxu0 }
 0xf7f   :  { %v3889_v15 = vpop.eup %3888 }
 0xf80   :  { %v2790_v16 = vadd.f32 1.0, %v3889_v15 }
 0xf82   :  { %3890 = vrcp.f32 %v2790_v16 }
 0xf88   :  { %v3891_v17 = vpop.eup %3890 }
 0xf89   :  { %2793 = vst.msk [vmem:[%s4151_s3] sm:$0xff] %vm2792_vm12, %v3891_v17 }
 0xf8a   :  { %2798 = vsyncpa [#allocation5], 1 }
 0xf8b   :  { %2799 = vsyncmov [#allocation3] }
 0xf8e   :  { %s2800_s16 = vpop.sfrf %2799 }
 0xf8f   :  { %p3627_p0 = scmp.ne.s32.totalorder %s2800_s16, 0 }
 0xf91   :  { %2804 = shalt.err (%p3627_p0)  }
 0xf92   :  { %2806 = vsyncmov [#allocation3 + $0x1] }
 0xf95   :  { %s2807_s17 = vpop.sfrf %2806 }
 0xf96   :  { %p3628_p1 = scmp.ne.s32.totalorder %s2807_s17, 0 }
 0xf98   :  { %2811 = shalt.err (%p3628_p1)  }

</bundles_post_ra>
